<compile_context>
chip_gen: v7x
topology: tpu7x:2x2x1
jax: 0.10.0
libtpu: 0.0.40
codegen_flags: <defaults>
</compile_context>

<pallas_src>
import math
import functools

import jax
import jax.numpy as jnp
from jax.experimental import pallas as pl
from jax.experimental.pallas import tpu as pltpu

# ----- small synthetic "bert-base" config (scaled down) -----
VOCAB = 50
TYPE_VOCAB = 2
MAX_POS = 16
HIDDEN = 32
HEADS = 4
HEAD_DIM = HIDDEN // HEADS
FFN = 64
LAYERS = 2
CODE_LEN = 16
LN_EPS = 1e-12


def _layer_norm(x, g, b):
    mean = jnp.mean(x, axis=-1, keepdims=True)
    var = jnp.mean((x - mean) ** 2, axis=-1, keepdims=True)
    return (x - mean) * jax.lax.rsqrt(var + LN_EPS) * g + b


# ---------------------------------------------------------------------------
# Fused whole-model kernel: one grid step == one batch element (full forward).
# ---------------------------------------------------------------------------
def _bert_kernel(
    # per-batch inputs
    tok_ref, seg_ref, maskb_ref,
    # embedding params (resident)
    pemb_ref, wemb_ref, temb_ref, eg_ref, eb_ref,
    # all-layer weights, stacked on a leading layer axis (resident)
    wqkv_ref, bqkv_ref, wo_ref, bo_ref, ln1g_ref, ln1b_ref,
    w1_ref, b1_ref, w2_ref, b2_ref, ln2g_ref, ln2b_ref,
    # head weights
    fcw_ref, fcb_ref,
    # output
    out_ref,
    *, seq):
    scale = 1.0 / math.sqrt(HEAD_DIM)

    # ---- embeddings: data-dependent token one-hot matmul, direct position add,
    #      2-entry token-type select, then embedding LayerNorm.
    tok_oh = (tok_ref[...] == jax.lax.broadcasted_iota(
        jnp.int32, (seq, VOCAB), 1)).astype(jnp.bfloat16)             # exact 0/1
    emb = jnp.dot(tok_oh, wemb_ref[...], preferred_element_type=jnp.float32)
    temb = temb_ref[...]                                              # [2, H]
    seg_f = seg_ref[...].astype(jnp.float32)                          # [S, 1]
    emb = emb + pemb_ref[...] + temb[0:1, :] + seg_f * (temb[1:2, :] - temb[0:1, :])
    x = _layer_norm(emb, eg_ref[...], eb_ref[...])                    # [S, H] f32

    mb = maskb_ref[...]                                               # [1, 1, S]

    # ---- encoder layers: unrolled, all weights already resident in VMEM
    for l in range(LAYERS):
        x_bf = x.astype(jnp.bfloat16)
        # head-major fused QKV: single batched matmul over the 3*HEADS slabs
        x_b = jnp.broadcast_to(x_bf[None], (3 * HEADS, seq, HIDDEN))
        qkv = jnp.einsum('hsi,hid->hsd', x_b, wqkv_ref[l],
                         preferred_element_type=jnp.float32) + bqkv_ref[l]   # [3Hd,S,Dh]
        q = qkv[:HEADS]
        k = qkv[HEADS:2 * HEADS]
        v = qkv[2 * HEADS:]

        s = jnp.einsum('hqd,hkd->hqk',
                       q.astype(jnp.bfloat16), k.astype(jnp.bfloat16),
                       preferred_element_type=jnp.float32) * scale + mb      # [Hd,S,S]
        s = s - jnp.max(s, axis=-1, keepdims=True)
        p = jnp.exp(s)
        p = p / jnp.sum(p, axis=-1, keepdims=True)                           # exact softmax
        ctx = jnp.einsum('hqk,hkd->hqd',
                         p.astype(jnp.bfloat16), v.astype(jnp.bfloat16),
                         preferred_element_type=jnp.float32)                 # [Hd,S,Dh]
        # per-head output projection, then sum over heads (== concat-heads @ Wo)
        out_h = jnp.einsum('hqd,hdo->hqo',
                           ctx.astype(jnp.bfloat16), wo_ref[l],
                           preferred_element_type=jnp.float32)               # [Hd,S,H]
        attn = jnp.sum(out_h, axis=0) + bo_ref[l]                            # [S, H]
        x = _layer_norm(attn + x, ln1g_ref[l], ln1b_ref[l])                  # residual+LN1

        h1 = jnp.dot(x.astype(jnp.bfloat16), w1_ref[l],
                     preferred_element_type=jnp.float32) + b1_ref[l]
        # TODO(synk): HF BERT uses exact erf-GELU; tanh-approx GELU used here.
        h1 = jax.nn.gelu(h1, approximate=True)
        ffn = jnp.dot(h1.astype(jnp.bfloat16), w2_ref[l],
                      preferred_element_type=jnp.float32) + b2_ref[l]
        x = _layer_norm(ffn + x, ln2g_ref[l], ln2b_ref[l])                   # residual+LN2

    # ---- CLS row (direct read) + fc + tanh, fused
    cls = x[0:1, :].astype(jnp.bfloat16)                                     # [1, H]
    feats = jnp.dot(cls, fcw_ref[...],
                    preferred_element_type=jnp.float32) + fcb_ref[...]
    out_ref[0] = jnp.tanh(feats)                                             # [1, CODE_LEN]


# ---------------------------------------------------------------------------
# Parameter init (deterministic, synthetic)
# ---------------------------------------------------------------------------
def init_params(key):
    keys = iter(jax.random.split(key, 8 + LAYERS * 16))

    def normal(shape):
        return jax.random.normal(next(keys), shape, jnp.float32) * 0.02

    params = {
        "word_emb": normal((VOCAB, HIDDEN)),
        "pos_emb": normal((MAX_POS, HIDDEN)),
        "type_emb": normal((TYPE_VOCAB, HIDDEN)),
        "emb_ln_g": jnp.ones((HIDDEN,), jnp.float32),
        "emb_ln_b": jnp.zeros((HIDDEN,), jnp.float32),
        "layers": [],
        "fc_w": normal((HIDDEN, CODE_LEN)),
        "fc_b": jnp.zeros((CODE_LEN,), jnp.float32),
    }
    for _ in range(LAYERS):
        params["layers"].append({
            "wq": normal((HIDDEN, HIDDEN)), "bq": jnp.zeros((HIDDEN,), jnp.float32),
            "wk": normal((HIDDEN, HIDDEN)), "bk": jnp.zeros((HIDDEN,), jnp.float32),
            "wv": normal((HIDDEN, HIDDEN)), "bv": jnp.zeros((HIDDEN,), jnp.float32),
            "wo": normal((HIDDEN, HIDDEN)), "bo": jnp.zeros((HIDDEN,), jnp.float32),
            "ln1_g": jnp.ones((HIDDEN,), jnp.float32),
            "ln1_b": jnp.zeros((HIDDEN,), jnp.float32),
            "w1": normal((HIDDEN, FFN)), "b1": jnp.zeros((FFN,), jnp.float32),
            "w2": normal((FFN, HIDDEN)), "b2": jnp.zeros((HIDDEN,), jnp.float32),
            "ln2_g": jnp.ones((HIDDEN,), jnp.float32),
            "ln2_b": jnp.zeros((HIDDEN,), jnp.float32),
        })
    return params


# ---------------------------------------------------------------------------
# Forward pass: BertModel(tokens, segments, mask) -> [:,0,:] -> fc -> tanh
# Single fused pallas_call; grid = batch ("parallel" -> both v7x TensorCores used).
# ---------------------------------------------------------------------------
def bert_text_net(params, tokens, segments, input_masks):
    B, S = tokens.shape
    L = params["layers"]
    bf16 = jnp.bfloat16

    def head_major(w):                    # [H, H] -> [HEADS, H, Dh]
        return w.reshape(HIDDEN, HEADS, HEAD_DIM).transpose(1, 0, 2)

    def head_bias(b):                     # [H] -> [HEADS, 1, Dh]
        return b.reshape(HEADS, 1, HEAD_DIM)

    # stacked, head-major, bf16 weights (biases / LN params stay f32)
    wqkv = jnp.stack([jnp.concatenate(
        [head_major(lp["wq"]), head_major(lp["wk"]), head_major(lp["wv"])], axis=0)
        for lp in L]).astype(bf16)                                  # [Lyr, 3*HEADS, H, Dh]
    bqkv = jnp.stack([jnp.concatenate(
        [head_bias(lp["bq"]), head_bias(lp["bk"]), head_bias(lp["bv"])], axis=0)
        for lp in L])                                               # [Lyr, 3*HEADS, 1, Dh]
    wo = jnp.stack([lp["wo"].reshape(HEADS, HEAD_DIM, HIDDEN)
                    for lp in L]).astype(bf16)                      # [Lyr, HEADS, Dh, H]
    bo = jnp.stack([lp["bo"][None, :] for lp in L])
    ln1g = jnp.stack([lp["ln1_g"][None, :] for lp in L])
    ln1b = jnp.stack([lp["ln1_b"][None, :] for lp in L])
    w1 = jnp.stack([lp["w1"] for lp in L]).astype(bf16)
    b1 = jnp.stack([lp["b1"][None, :] for lp in L])
    w2 = jnp.stack([lp["w2"] for lp in L]).astype(bf16)
    b2 = jnp.stack([lp["b2"][None, :] for lp in L])
    ln2g = jnp.stack([lp["ln2_g"][None, :] for lp in L])
    ln2b = jnp.stack([lp["ln2_b"][None, :] for lp in L])

    tok2 = tokens.reshape(B * S, 1).astype(jnp.int32)
    seg2 = segments.reshape(B * S, 1).astype(jnp.int32)
    # additive mask bias precomputed once (1.0 valid -> 0.0, 0.0 pad -> -1e4)
    mask_bias = ((1.0 - input_masks.astype(jnp.float32)) * -10000.0).reshape(B, 1, S)
    pemb = params["pos_emb"][:S, :]                                 # positions 0..S-1
    wemb = params["word_emb"].astype(bf16)
    temb = params["type_emb"]
    emb_g = params["emb_ln_g"][None, :]
    emb_b = params["emb_ln_b"][None, :]
    fc_w = params["fc_w"].astype(bf16)
    fc_b = params["fc_b"][None, :]

    def const_spec(*shape):
        zeros = (0,) * len(shape)
        def idx(b):
            return zeros
        return pl.BlockSpec(shape, idx)

    kernel = functools.partial(_bert_kernel, seq=S)
    out = pl.pallas_call(
        kernel,
        out_shape=jax.ShapeDtypeStruct((B, 1, CODE_LEN), jnp.float32),
        grid=(B,),
        in_specs=[
            pl.BlockSpec((S, 1), lambda b: (b, 0)),        # token ids for this batch
            pl.BlockSpec((S, 1), lambda b: (b, 0)),        # segment ids
            pl.BlockSpec((1, 1, S), lambda b: (b, 0, 0)),  # additive mask bias
            const_spec(S, HIDDEN),                          # position embeddings (direct add)
            const_spec(VOCAB, HIDDEN),                      # word embedding table (bf16)
            const_spec(TYPE_VOCAB, HIDDEN),                 # token-type table
            const_spec(1, HIDDEN),                          # embedding LN gamma
            const_spec(1, HIDDEN),                          # embedding LN beta
            const_spec(LAYERS, 3 * HEADS, HIDDEN, HEAD_DIM),  # head-major Wq|Wk|Wv
            const_spec(LAYERS, 3 * HEADS, 1, HEAD_DIM),       # head-major bq|bk|bv
            const_spec(LAYERS, HEADS, HEAD_DIM, HIDDEN),      # head-major Wo
            const_spec(LAYERS, 1, HIDDEN),                    # bo
            const_spec(LAYERS, 1, HIDDEN),                    # LN1 gamma
            const_spec(LAYERS, 1, HIDDEN),                    # LN1 beta
            const_spec(LAYERS, HIDDEN, FFN),                  # W1
            const_spec(LAYERS, 1, FFN),                       # b1
            const_spec(LAYERS, FFN, HIDDEN),                  # W2
            const_spec(LAYERS, 1, HIDDEN),                    # b2
            const_spec(LAYERS, 1, HIDDEN),                    # LN2 gamma
            const_spec(LAYERS, 1, HIDDEN),                    # LN2 beta
            const_spec(HIDDEN, CODE_LEN),                     # fc weight
            const_spec(1, CODE_LEN),                          # fc bias
        ],
        out_specs=pl.BlockSpec((1, 1, CODE_LEN), lambda b: (b, 0, 0)),
        compiler_params=pltpu.CompilerParams(
            dimension_semantics=("parallel",),
            vmem_limit_bytes=32 * 1024 * 1024),
    )(tok2, seg2, mask_bias, pemb, wemb, temb, emb_g, emb_b,
      wqkv, bqkv, wo, bo, ln1g, ln1b, w1, b1, w2, b2, ln2g, ln2b,
      fc_w, fc_b)
    return out[:, 0, :]


if __name__ == "__main__":
    key = jax.random.PRNGKey(0)
    pkey, tkey = jax.random.split(key, 2)
    params = init_params(pkey)

    B, S = 2, 8
    tokens = jax.random.randint(tkey, (B, S), 0, VOCAB, dtype=jnp.int32)
    segments = jnp.zeros((B, S), jnp.int32).at[:, S // 2:].set(1)
    input_masks = jnp.ones((B, S), jnp.int32).at[1, 6:].set(0)

    feats = jax.jit(bert_text_net)(params, tokens, segments, input_masks)
    feats = jax.block_until_ready(feats)
    assert feats.shape == (B, CODE_LEN)
    assert bool(jnp.all(jnp.isfinite(feats)))
    print("KERNEL_OK")
</pallas_src>

<mosaic_0001>
module attributes {stable_mosaic.version = 11 : i64} {
  func.func @_bert_kernel(%arg0: i32, %arg1: memref<8x1xi32, #tpu.memory_space<vmem>>, %arg2: memref<8x1xi32, #tpu.memory_space<vmem>>, %arg3: memref<1x1x8xf32, #tpu.memory_space<vmem>>, %arg4: memref<8x32xf32, #tpu.memory_space<vmem>>, %arg5: memref<50x32xbf16, #tpu.memory_space<vmem>>, %arg6: memref<2x32xf32, #tpu.memory_space<vmem>>, %arg7: memref<1x32xf32, #tpu.memory_space<vmem>>, %arg8: memref<1x32xf32, #tpu.memory_space<vmem>>, %arg9: memref<2x12x32x8xbf16, #tpu.memory_space<vmem>>, %arg10: memref<2x12x1x8xf32, #tpu.memory_space<vmem>>, %arg11: memref<2x4x8x32xbf16, #tpu.memory_space<vmem>>, %arg12: memref<2x1x32xf32, #tpu.memory_space<vmem>>, %arg13: memref<2x1x32xf32, #tpu.memory_space<vmem>>, %arg14: memref<2x1x32xf32, #tpu.memory_space<vmem>>, %arg15: memref<2x32x64xbf16, #tpu.memory_space<vmem>>, %arg16: memref<2x1x64xf32, #tpu.memory_space<vmem>>, %arg17: memref<2x64x32xbf16, #tpu.memory_space<vmem>>, %arg18: memref<2x1x32xf32, #tpu.memory_space<vmem>>, %arg19: memref<2x1x32xf32, #tpu.memory_space<vmem>>, %arg20: memref<2x1x32xf32, #tpu.memory_space<vmem>>, %arg21: memref<32x16xbf16, #tpu.memory_space<vmem>>, %arg22: memref<1x16xf32, #tpu.memory_space<vmem>>, %arg23: memref<1x1x16xf32, #tpu.memory_space<vmem>>) attributes {dimension_semantics = [#tpu.dimension_semantics<parallel>], iteration_bounds = array<i64: 2>, scalar_prefetch = 0 : i64, scratch_operands = 0 : i64, tpu.core_type = #tpu.core_type<tc>, window_params = [{transform_indices = @transform_0, window_bounds = array<i64: 8, 1>}, {transform_indices = @transform_1, window_bounds = array<i64: 8, 1>}, {transform_indices = @transform_2, window_bounds = array<i64: 1, 1, 8>}, {pipeline_mode = #tpu.pipeline_mode<synchronous>, transform_indices = @transform_3, window_bounds = array<i64: 8, 32>}, {pipeline_mode = #tpu.pipeline_mode<synchronous>, transform_indices = @transform_4, window_bounds = array<i64: 50, 32>}, {pipeline_mode = #tpu.pipeline_mode<synchronous>, transform_indices = @transform_5, window_bounds = array<i64: 2, 32>}, {pipeline_mode = #tpu.pipeline_mode<synchronous>, transform_indices = @transform_6, window_bounds = array<i64: 1, 32>}, {pipeline_mode = #tpu.pipeline_mode<synchronous>, transform_indices = @transform_7, window_bounds = array<i64: 1, 32>}, {pipeline_mode = #tpu.pipeline_mode<synchronous>, transform_indices = @transform_8, window_bounds = array<i64: 2, 12, 32, 8>}, {pipeline_mode = #tpu.pipeline_mode<synchronous>, transform_indices = @transform_9, window_bounds = array<i64: 2, 12, 1, 8>}, {pipeline_mode = #tpu.pipeline_mode<synchronous>, transform_indices = @transform_10, window_bounds = array<i64: 2, 4, 8, 32>}, {pipeline_mode = #tpu.pipeline_mode<synchronous>, transform_indices = @transform_11, window_bounds = array<i64: 2, 1, 32>}, {pipeline_mode = #tpu.pipeline_mode<synchronous>, transform_indices = @transform_12, window_bounds = array<i64: 2, 1, 32>}, {pipeline_mode = #tpu.pipeline_mode<synchronous>, transform_indices = @transform_13, window_bounds = array<i64: 2, 1, 32>}, {pipeline_mode = #tpu.pipeline_mode<synchronous>, transform_indices = @transform_14, window_bounds = array<i64: 2, 32, 64>}, {pipeline_mode = #tpu.pipeline_mode<synchronous>, transform_indices = @transform_15, window_bounds = array<i64: 2, 1, 64>}, {pipeline_mode = #tpu.pipeline_mode<synchronous>, transform_indices = @transform_16, window_bounds = array<i64: 2, 64, 32>}, {pipeline_mode = #tpu.pipeline_mode<synchronous>, transform_indices = @transform_17, window_bounds = array<i64: 2, 1, 32>}, {pipeline_mode = #tpu.pipeline_mode<synchronous>, transform_indices = @transform_18, window_bounds = array<i64: 2, 1, 32>}, {pipeline_mode = #tpu.pipeline_mode<synchronous>, transform_indices = @transform_19, window_bounds = array<i64: 2, 1, 32>}, {pipeline_mode = #tpu.pipeline_mode<synchronous>, transform_indices = @transform_20, window_bounds = array<i64: 32, 16>}, {pipeline_mode = #tpu.pipeline_mode<synchronous>, transform_indices = @transform_21, window_bounds = array<i64: 1, 16>}, {transform_indices = @transform_22, window_bounds = array<i64: 1, 1, 16>}]} {
    %c0 = arith.constant 0 : index
    %c0_0 = arith.constant 0 : index
    %0 = vector.load %arg1[%c0, %c0_0] : memref<8x1xi32, #tpu.memory_space<vmem>>, vector<8x1xi32>
    %1 = tpu.iota {dimensions = array<i32: 1>} : vector<8x50xi32>
    %2 = vector.broadcast %0 : vector<8x1xi32> to vector<8x50xi32>
    %3 = arith.cmpi eq, %2, %1 : vector<8x50xi32>
    %4 = arith.extui %3 : vector<8x50xi1> to vector<8x50xi32>
    %5 = arith.sitofp %4 : vector<8x50xi32> to vector<8x50xf32>
    %6 = arith.truncf %5 : vector<8x50xf32> to vector<8x50xbf16>
    %c0_1 = arith.constant 0 : index
    %c0_2 = arith.constant 0 : index
    %7 = vector.load %arg5[%c0_1, %c0_2] : memref<50x32xbf16, #tpu.memory_space<vmem>>, vector<50x32xbf16>
    %cst = arith.constant dense<0.000000e+00> : vector<8x32xf32>
    %8 = tpu.matmul %6, %7, %cst {dimension_numbers = #tpu.dot_dimension_numbers<[1], [0], [0], [1], [0, 0, 1, 1], [], []>} : vector<8x50xbf16>, vector<50x32xbf16>, vector<8x32xf32> -> vector<8x32xf32>
    %c0_3 = arith.constant 0 : index
    %c0_4 = arith.constant 0 : index
    %9 = vector.load %arg6[%c0_3, %c0_4] : memref<2x32xf32, #tpu.memory_space<vmem>>, vector<2x32xf32>
    %c0_5 = arith.constant 0 : index
    %c0_6 = arith.constant 0 : index
    %10 = vector.load %arg2[%c0_5, %c0_6] : memref<8x1xi32, #tpu.memory_space<vmem>>, vector<8x1xi32>
    %11 = arith.sitofp %10 : vector<8x1xi32> to vector<8x1xf32>
    %c0_7 = arith.constant 0 : index
    %c0_8 = arith.constant 0 : index
    %12 = vector.load %arg4[%c0_7, %c0_8] : memref<8x32xf32, #tpu.memory_space<vmem>>, vector<8x32xf32>
    %13 = arith.addf %8, %12 : vector<8x32xf32>
    %14 = vector.extract_strided_slice %9 {offsets = [0, 0], sizes = [1, 32], strides = [1, 1]} : vector<2x32xf32> to vector<1x32xf32>
    %15 = vector.broadcast %14 : vector<1x32xf32> to vector<8x32xf32>
    %16 = arith.addf %13, %15 : vector<8x32xf32>
    %17 = vector.extract_strided_slice %9 {offsets = [1, 0], sizes = [1, 32], strides = [1, 1]} : vector<2x32xf32> to vector<1x32xf32>
    %18 = vector.extract_strided_slice %9 {offsets = [0, 0], sizes = [1, 32], strides = [1, 1]} : vector<2x32xf32> to vector<1x32xf32>
    %19 = arith.subf %17, %18 : vector<1x32xf32>
    %20 = vector.broadcast %11 : vector<8x1xf32> to vector<8x32xf32>
    %21 = vector.broadcast %19 : vector<1x32xf32> to vector<8x32xf32>
    %22 = arith.mulf %20, %21 : vector<8x32xf32>
    %23 = arith.addf %16, %22 : vector<8x32xf32>
    %c0_9 = arith.constant 0 : index
    %c0_10 = arith.constant 0 : index
    %24 = vector.load %arg7[%c0_9, %c0_10] : memref<1x32xf32, #tpu.memory_space<vmem>>, vector<1x32xf32>
    %c0_11 = arith.constant 0 : index
    %c0_12 = arith.constant 0 : index
    %25 = vector.load %arg8[%c0_11, %c0_12] : memref<1x32xf32, #tpu.memory_space<vmem>>, vector<1x32xf32>
    %cst_13 = arith.constant dense<0.000000e+00> : vector<8xf32>
    %26 = vector.multi_reduction <add>, %23, %cst_13 [1] : vector<8x32xf32> to vector<8xf32>
    %27 = vector.shape_cast %26 : vector<8xf32> to vector<8x1xf32>
    %cst_14 = arith.constant 3.200000e+01 : f32
    %28 = vector.broadcast %cst_14 : f32 to vector<8x1xf32>
    %29 = arith.divf %27, %28 : vector<8x1xf32>
    %30 = vector.broadcast %29 : vector<8x1xf32> to vector<8x32xf32>
    %31 = arith.subf %23, %30 : vector<8x32xf32>
    %32 = arith.mulf %31, %31 : vector<8x32xf32>
    %cst_15 = arith.constant dense<0.000000e+00> : vector<8xf32>
    %33 = vector.multi_reduction <add>, %32, %cst_15 [1] : vector<8x32xf32> to vector<8xf32>
    %34 = vector.shape_cast %33 : vector<8xf32> to vector<8x1xf32>
    %cst_16 = arith.constant 3.200000e+01 : f32
    %35 = vector.broadcast %cst_16 : f32 to vector<8x1xf32>
    %36 = arith.divf %34, %35 : vector<8x1xf32>
    %37 = vector.broadcast %29 : vector<8x1xf32> to vector<8x32xf32>
    %38 = arith.subf %23, %37 : vector<8x32xf32>
    %cst_17 = arith.constant 9.99999996E-13 : f32
    %39 = vector.broadcast %cst_17 : f32 to vector<8x1xf32>
    %40 = arith.addf %36, %39 : vector<8x1xf32>
    %41 = math.rsqrt %40 : vector<8x1xf32>
    %42 = vector.broadcast %41 : vector<8x1xf32> to vector<8x32xf32>
    %43 = arith.mulf %38, %42 : vector<8x32xf32>
    %44 = vector.broadcast %24 : vector<1x32xf32> to vector<8x32xf32>
    %45 = arith.mulf %43, %44 : vector<8x32xf32>
    %46 = vector.broadcast %25 : vector<1x32xf32> to vector<8x32xf32>
    %47 = arith.addf %45, %46 : vector<8x32xf32>
    %c0_18 = arith.constant 0 : index
    %c0_19 = arith.constant 0 : index
    %c0_20 = arith.constant 0 : index
    %48 = vector.load %arg3[%c0_18, %c0_19, %c0_20] : memref<1x1x8xf32, #tpu.memory_space<vmem>>, vector<1x1x8xf32>
    %49 = arith.truncf %47 : vector<8x32xf32> to vector<8x32xbf16>
    %50 = vector.shape_cast %49 : vector<8x32xbf16> to vector<1x8x32xbf16>
    %51 = vector.shape_cast %50 : vector<1x8x32xbf16> to vector<1x8x32xbf16>
    %52 = vector.broadcast %51 : vector<1x8x32xbf16> to vector<12x8x32xbf16>
    %c0_21 = arith.constant 0 : index
    %c0_22 = arith.constant 0 : index
    %c0_23 = arith.constant 0 : index
    %c0_24 = arith.constant 0 : index
    %53 = vector.load %arg9[%c0_21, %c0_22, %c0_23, %c0_24] : memref<2x12x32x8xbf16, #tpu.memory_space<vmem>>, vector<1x12x32x8xbf16>
    %54 = vector.shape_cast %53 : vector<1x12x32x8xbf16> to vector<12x32x8xbf16>
    "tpu.trace_start"() <{level = 10 : i32, message = "hsi,hid->hsd"}> : () -> ()
    %cst_25 = arith.constant dense<0.000000e+00> : vector<12x8x8xf32>
    %55 = tpu.matmul %52, %54, %cst_25 {dimension_numbers = #tpu.dot_dimension_numbers<[2], [1], [1], [2], [0, 0, 0, 1, 1, 2], [0], [0]>} : vector<12x8x32xbf16>, vector<12x32x8xbf16>, vector<12x8x8xf32> -> vector<12x8x8xf32>
    "tpu.trace_stop"() : () -> ()
    %c0_26 = arith.constant 0 : index
    %c0_27 = arith.constant 0 : index
    %c0_28 = arith.constant 0 : index
    %c0_29 = arith.constant 0 : index
    %56 = vector.load %arg10[%c0_26, %c0_27, %c0_28, %c0_29] : memref<2x12x1x8xf32, #tpu.memory_space<vmem>>, vector<1x12x1x8xf32>
    %57 = vector.shape_cast %56 : vector<1x12x1x8xf32> to vector<12x1x8xf32>
    %58 = vector.broadcast %57 : vector<12x1x8xf32> to vector<12x8x8xf32>
    %59 = arith.addf %55, %58 : vector<12x8x8xf32>
    %60 = vector.extract_strided_slice %59 {offsets = [0, 0, 0], sizes = [4, 8, 8], strides = [1, 1, 1]} : vector<12x8x8xf32> to vector<4x8x8xf32>
    %61 = vector.extract_strided_slice %59 {offsets = [4, 0, 0], sizes = [4, 8, 8], strides = [1, 1, 1]} : vector<12x8x8xf32> to vector<4x8x8xf32>
    %62 = vector.extract_strided_slice %59 {offsets = [8, 0, 0], sizes = [4, 8, 8], strides = [1, 1, 1]} : vector<12x8x8xf32> to vector<4x8x8xf32>
    %63 = arith.truncf %60 : vector<4x8x8xf32> to vector<4x8x8xbf16>
    %64 = arith.truncf %61 : vector<4x8x8xf32> to vector<4x8x8xbf16>
    "tpu.trace_start"() <{level = 10 : i32, message = "hqd,hkd->hqk"}> : () -> ()
    %cst_30 = arith.constant dense<0.000000e+00> : vector<4x8x8xf32>
    %65 = tpu.matmul %63, %64, %cst_30 {dimension_numbers = #tpu.dot_dimension_numbers<[2], [2], [1], [1], [0, 0, 0, 1, 1, 1], [0], [0]>} : vector<4x8x8xbf16>, vector<4x8x8xbf16>, vector<4x8x8xf32> -> vector<4x8x8xf32>
    "tpu.trace_stop"() : () -> ()
    %cst_31 = arith.constant 0.353553385 : f32
    %66 = vector.broadcast %cst_31 : f32 to vector<4x8x8xf32>
    %67 = arith.mulf %65, %66 : vector<4x8x8xf32>
    %68 = vector.broadcast %48 : vector<1x1x8xf32> to vector<4x8x8xf32>
    %69 = arith.addf %67, %68 : vector<4x8x8xf32>
    %cst_32 = arith.constant dense<0xFF800000> : vector<4x8xf32>
    %70 = vector.multi_reduction <maximumf>, %69, %cst_32 [2] : vector<4x8x8xf32> to vector<4x8xf32>
    %71 = vector.shape_cast %70 : vector<4x8xf32> to vector<4x8x1xf32>
    %72 = vector.broadcast %71 : vector<4x8x1xf32> to vector<4x8x8xf32>
    %73 = arith.subf %69, %72 : vector<4x8x8xf32>
    %74 = math.exp %73 : vector<4x8x8xf32>
    %cst_33 = arith.constant dense<0.000000e+00> : vector<4x8xf32>
    %75 = vector.multi_reduction <add>, %74, %cst_33 [2] : vector<4x8x8xf32> to vector<4x8xf32>
    %76 = vector.shape_cast %75 : vector<4x8xf32> to vector<4x8x1xf32>
    %77 = vector.broadcast %76 : vector<4x8x1xf32> to vector<4x8x8xf32>
    %78 = arith.divf %74, %77 : vector<4x8x8xf32>
    %79 = arith.truncf %78 : vector<4x8x8xf32> to vector<4x8x8xbf16>
    %80 = arith.truncf %62 : vector<4x8x8xf32> to vector<4x8x8xbf16>
    "tpu.trace_start"() <{level = 10 : i32, message = "hqk,hkd->hqd"}> : () -> ()
    %cst_34 = arith.constant dense<0.000000e+00> : vector<4x8x8xf32>
    %81 = tpu.matmul %79, %80, %cst_34 {dimension_numbers = #tpu.dot_dimension_numbers<[2], [1], [1], [2], [0, 0, 0, 1, 1, 2], [0], [0]>} : vector<4x8x8xbf16>, vector<4x8x8xbf16>, vector<4x8x8xf32> -> vector<4x8x8xf32>
    "tpu.trace_stop"() : () -> ()
    %82 = arith.truncf %81 : vector<4x8x8xf32> to vector<4x8x8xbf16>
    %c0_35 = arith.constant 0 : index
    %c0_36 = arith.constant 0 : index
    %c0_37 = arith.constant 0 : index
    %c0_38 = arith.constant 0 : index
    %83 = vector.load %arg11[%c0_35, %c0_36, %c0_37, %c0_38] : memref<2x4x8x32xbf16, #tpu.memory_space<vmem>>, vector<1x4x8x32xbf16>
    %84 = vector.shape_cast %83 : vector<1x4x8x32xbf16> to vector<4x8x32xbf16>
    "tpu.trace_start"() <{level = 10 : i32, message = "hqd,hdo->hqo"}> : () -> ()
    %cst_39 = arith.constant dense<0.000000e+00> : vector<4x8x32xf32>
    %85 = tpu.matmul %82, %84, %cst_39 {dimension_numbers = #tpu.dot_dimension_numbers<[2], [1], [1], [2], [0, 0, 0, 1, 1, 2], [0], [0]>} : vector<4x8x8xbf16>, vector<4x8x32xbf16>, vector<4x8x32xf32> -> vector<4x8x32xf32>
    "tpu.trace_stop"() : () -> ()
    %cst_40 = arith.constant dense<0.000000e+00> : vector<8x32xf32>
    %86 = vector.multi_reduction <add>, %85, %cst_40 [0] : vector<4x8x32xf32> to vector<8x32xf32>
    %c0_41 = arith.constant 0 : index
    %c0_42 = arith.constant 0 : index
    %c0_43 = arith.constant 0 : index
    %87 = vector.load %arg12[%c0_41, %c0_42, %c0_43] : memref<2x1x32xf32, #tpu.memory_space<vmem>>, vector<1x1x32xf32>
    %88 = vector.shape_cast %87 : vector<1x1x32xf32> to vector<1x32xf32>
    %89 = vector.broadcast %88 : vector<1x32xf32> to vector<8x32xf32>
    %90 = arith.addf %86, %89 : vector<8x32xf32>
    %91 = arith.addf %90, %47 : vector<8x32xf32>
    %c0_44 = arith.constant 0 : index
    %c0_45 = arith.constant 0 : index
    %c0_46 = arith.constant 0 : index
    %92 = vector.load %arg13[%c0_44, %c0_45, %c0_46] : memref<2x1x32xf32, #tpu.memory_space<vmem>>, vector<1x1x32xf32>
    %93 = vector.shape_cast %92 : vector<1x1x32xf32> to vector<1x32xf32>
    %c0_47 = arith.constant 0 : index
    %c0_48 = arith.constant 0 : index
    %c0_49 = arith.constant 0 : index
    %94 = vector.load %arg14[%c0_47, %c0_48, %c0_49] : memref<2x1x32xf32, #tpu.memory_space<vmem>>, vector<1x1x32xf32>
    %95 = vector.shape_cast %94 : vector<1x1x32xf32> to vector<1x32xf32>
    %cst_50 = arith.constant dense<0.000000e+00> : vector<8xf32>
    %96 = vector.multi_reduction <add>, %91, %cst_50 [1] : vector<8x32xf32> to vector<8xf32>
    %97 = vector.shape_cast %96 : vector<8xf32> to vector<8x1xf32>
    %cst_51 = arith.constant 3.200000e+01 : f32
    %98 = vector.broadcast %cst_51 : f32 to vector<8x1xf32>
    %99 = arith.divf %97, %98 : vector<8x1xf32>
    %100 = vector.broadcast %99 : vector<8x1xf32> to vector<8x32xf32>
    %101 = arith.subf %91, %100 : vector<8x32xf32>
    %102 = arith.mulf %101, %101 : vector<8x32xf32>
    %cst_52 = arith.constant dense<0.000000e+00> : vector<8xf32>
    %103 = vector.multi_reduction <add>, %102, %cst_52 [1] : vector<8x32xf32> to vector<8xf32>
    %104 = vector.shape_cast %103 : vector<8xf32> to vector<8x1xf32>
    %cst_53 = arith.constant 3.200000e+01 : f32
    %105 = vector.broadcast %cst_53 : f32 to vector<8x1xf32>
    %106 = arith.divf %104, %105 : vector<8x1xf32>
    %107 = vector.broadcast %99 : vector<8x1xf32> to vector<8x32xf32>
    %108 = arith.subf %91, %107 : vector<8x32xf32>
    %cst_54 = arith.constant 9.99999996E-13 : f32
    %109 = vector.broadcast %cst_54 : f32 to vector<8x1xf32>
    %110 = arith.addf %106, %109 : vector<8x1xf32>
    %111 = math.rsqrt %110 : vector<8x1xf32>
    %112 = vector.broadcast %111 : vector<8x1xf32> to vector<8x32xf32>
    %113 = arith.mulf %108, %112 : vector<8x32xf32>
    %114 = vector.broadcast %93 : vector<1x32xf32> to vector<8x32xf32>
    %115 = arith.mulf %113, %114 : vector<8x32xf32>
    %116 = vector.broadcast %95 : vector<1x32xf32> to vector<8x32xf32>
    %117 = arith.addf %115, %116 : vector<8x32xf32>
    %118 = arith.truncf %117 : vector<8x32xf32> to vector<8x32xbf16>
    %c0_55 = arith.constant 0 : index
    %c0_56 = arith.constant 0 : index
    %c0_57 = arith.constant 0 : index
    %119 = vector.load %arg15[%c0_55, %c0_56, %c0_57] : memref<2x32x64xbf16, #tpu.memory_space<vmem>>, vector<1x32x64xbf16>
    %120 = vector.shape_cast %119 : vector<1x32x64xbf16> to vector<32x64xbf16>
    %cst_58 = arith.constant dense<0.000000e+00> : vector<8x64xf32>
    %121 = tpu.matmul %118, %120, %cst_58 {dimension_numbers = #tpu.dot_dimension_numbers<[1], [0], [0], [1], [0, 0, 1, 1], [], []>} : vector<8x32xbf16>, vector<32x64xbf16>, vector<8x64xf32> -> vector<8x64xf32>
    %c0_59 = arith.constant 0 : index
    %c0_60 = arith.constant 0 : index
    %c0_61 = arith.constant 0 : index
    %122 = vector.load %arg16[%c0_59, %c0_60, %c0_61] : memref<2x1x64xf32, #tpu.memory_space<vmem>>, vector<1x1x64xf32>
    %123 = vector.shape_cast %122 : vector<1x1x64xf32> to vector<1x64xf32>
    %124 = vector.broadcast %123 : vector<1x64xf32> to vector<8x64xf32>
    %125 = arith.addf %121, %124 : vector<8x64xf32>
    %126 = arith.mulf %125, %125 : vector<8x64xf32>
    %127 = arith.mulf %125, %126 : vector<8x64xf32>
    %cst_62 = arith.constant 4.471500e-02 : f32
    %128 = vector.broadcast %cst_62 : f32 to vector<8x64xf32>
    %129 = arith.mulf %128, %127 : vector<8x64xf32>
    %130 = arith.addf %125, %129 : vector<8x64xf32>
    %cst_63 = arith.constant 0.797884583 : f32
    %131 = vector.broadcast %cst_63 : f32 to vector<8x64xf32>
    %132 = arith.mulf %131, %130 : vector<8x64xf32>
    %133 = math.tanh %132 : vector<8x64xf32>
    %cst_64 = arith.constant 1.000000e+00 : f32
    %134 = vector.broadcast %cst_64 : f32 to vector<8x64xf32>
    %135 = arith.addf %134, %133 : vector<8x64xf32>
    %cst_65 = arith.constant 5.000000e-01 : f32
    %136 = vector.broadcast %cst_65 : f32 to vector<8x64xf32>
    %137 = arith.mulf %136, %135 : vector<8x64xf32>
    %138 = arith.mulf %125, %137 : vector<8x64xf32>
    %139 = arith.truncf %138 : vector<8x64xf32> to vector<8x64xbf16>
    %c0_66 = arith.constant 0 : index
    %c0_67 = arith.constant 0 : index
    %c0_68 = arith.constant 0 : index
    %140 = vector.load %arg17[%c0_66, %c0_67, %c0_68] : memref<2x64x32xbf16, #tpu.memory_space<vmem>>, vector<1x64x32xbf16>
    %141 = vector.shape_cast %140 : vector<1x64x32xbf16> to vector<64x32xbf16>
    %cst_69 = arith.constant dense<0.000000e+00> : vector<8x32xf32>
    %142 = tpu.matmul %139, %141, %cst_69 {dimension_numbers = #tpu.dot_dimension_numbers<[1], [0], [0], [1], [0, 0, 1, 1], [], []>} : vector<8x64xbf16>, vector<64x32xbf16>, vector<8x32xf32> -> vector<8x32xf32>
    %c0_70 = arith.constant 0 : index
    %c0_71 = arith.constant 0 : index
    %c0_72 = arith.constant 0 : index
    %143 = vector.load %arg18[%c0_70, %c0_71, %c0_72] : memref<2x1x32xf32, #tpu.memory_space<vmem>>, vector<1x1x32xf32>
    %144 = vector.shape_cast %143 : vector<1x1x32xf32> to vector<1x32xf32>
    %145 = vector.broadcast %144 : vector<1x32xf32> to vector<8x32xf32>
    %146 = arith.addf %142, %145 : vector<8x32xf32>
    %147 = arith.addf %146, %117 : vector<8x32xf32>
    %c0_73 = arith.constant 0 : index
    %c0_74 = arith.constant 0 : index
    %c0_75 = arith.constant 0 : index
    %148 = vector.load %arg19[%c0_73, %c0_74, %c0_75] : memref<2x1x32xf32, #tpu.memory_space<vmem>>, vector<1x1x32xf32>
    %149 = vector.shape_cast %148 : vector<1x1x32xf32> to vector<1x32xf32>
    %c0_76 = arith.constant 0 : index
    %c0_77 = arith.constant 0 : index
    %c0_78 = arith.constant 0 : index
    %150 = vector.load %arg20[%c0_76, %c0_77, %c0_78] : memref<2x1x32xf32, #tpu.memory_space<vmem>>, vector<1x1x32xf32>
    %151 = vector.shape_cast %150 : vector<1x1x32xf32> to vector<1x32xf32>
    %cst_79 = arith.constant dense<0.000000e+00> : vector<8xf32>
    %152 = vector.multi_reduction <add>, %147, %cst_79 [1] : vector<8x32xf32> to vector<8xf32>
    %153 = vector.shape_cast %152 : vector<8xf32> to vector<8x1xf32>
    %cst_80 = arith.constant 3.200000e+01 : f32
    %154 = vector.broadcast %cst_80 : f32 to vector<8x1xf32>
    %155 = arith.divf %153, %154 : vector<8x1xf32>
    %156 = vector.broadcast %155 : vector<8x1xf32> to vector<8x32xf32>
    %157 = arith.subf %147, %156 : vector<8x32xf32>
    %158 = arith.mulf %157, %157 : vector<8x32xf32>
    %cst_81 = arith.constant dense<0.000000e+00> : vector<8xf32>
    %159 = vector.multi_reduction <add>, %158, %cst_81 [1] : vector<8x32xf32> to vector<8xf32>
    %160 = vector.shape_cast %159 : vector<8xf32> to vector<8x1xf32>
    %cst_82 = arith.constant 3.200000e+01 : f32
    %161 = vector.broadcast %cst_82 : f32 to vector<8x1xf32>
    %162 = arith.divf %160, %161 : vector<8x1xf32>
    %163 = vector.broadcast %155 : vector<8x1xf32> to vector<8x32xf32>
    %164 = arith.subf %147, %163 : vector<8x32xf32>
    %cst_83 = arith.constant 9.99999996E-13 : f32
    %165 = vector.broadcast %cst_83 : f32 to vector<8x1xf32>
    %166 = arith.addf %162, %165 : vector<8x1xf32>
    %167 = math.rsqrt %166 : vector<8x1xf32>
    %168 = vector.broadcast %167 : vector<8x1xf32> to vector<8x32xf32>
    %169 = arith.mulf %164, %168 : vector<8x32xf32>
    %170 = vector.broadcast %149 : vector<1x32xf32> to vector<8x32xf32>
    %171 = arith.mulf %169, %170 : vector<8x32xf32>
    %172 = vector.broadcast %151 : vector<1x32xf32> to vector<8x32xf32>
    %173 = arith.addf %171, %172 : vector<8x32xf32>
    %174 = arith.truncf %173 : vector<8x32xf32> to vector<8x32xbf16>
    %175 = vector.shape_cast %174 : vector<8x32xbf16> to vector<1x8x32xbf16>
    %176 = vector.shape_cast %175 : vector<1x8x32xbf16> to vector<1x8x32xbf16>
    %177 = vector.broadcast %176 : vector<1x8x32xbf16> to vector<12x8x32xbf16>
    %c1 = arith.constant 1 : index
    %c0_84 = arith.constant 0 : index
    %c0_85 = arith.constant 0 : index
    %c0_86 = arith.constant 0 : index
    %178 = vector.load %arg9[%c1, %c0_84, %c0_85, %c0_86] : memref<2x12x32x8xbf16, #tpu.memory_space<vmem>>, vector<1x12x32x8xbf16>
    %179 = vector.shape_cast %178 : vector<1x12x32x8xbf16> to vector<12x32x8xbf16>
    "tpu.trace_start"() <{level = 10 : i32, message = "hsi,hid->hsd"}> : () -> ()
    %cst_87 = arith.constant dense<0.000000e+00> : vector<12x8x8xf32>
    %180 = tpu.matmul %177, %179, %cst_87 {dimension_numbers = #tpu.dot_dimension_numbers<[2], [1], [1], [2], [0, 0, 0, 1, 1, 2], [0], [0]>} : vector<12x8x32xbf16>, vector<12x32x8xbf16>, vector<12x8x8xf32> -> vector<12x8x8xf32>
    "tpu.trace_stop"() : () -> ()
    %c1_88 = arith.constant 1 : index
    %c0_89 = arith.constant 0 : index
    %c0_90 = arith.constant 0 : index
    %c0_91 = arith.constant 0 : index
    %181 = vector.load %arg10[%c1_88, %c0_89, %c0_90, %c0_91] : memref<2x12x1x8xf32, #tpu.memory_space<vmem>>, vector<1x12x1x8xf32>
    %182 = vector.shape_cast %181 : vector<1x12x1x8xf32> to vector<12x1x8xf32>
    %183 = vector.broadcast %182 : vector<12x1x8xf32> to vector<12x8x8xf32>
    %184 = arith.addf %180, %183 : vector<12x8x8xf32>
    %185 = vector.extract_strided_slice %184 {offsets = [0, 0, 0], sizes = [4, 8, 8], strides = [1, 1, 1]} : vector<12x8x8xf32> to vector<4x8x8xf32>
    %186 = vector.extract_strided_slice %184 {offsets = [4, 0, 0], sizes = [4, 8, 8], strides = [1, 1, 1]} : vector<12x8x8xf32> to vector<4x8x8xf32>
    %187 = vector.extract_strided_slice %184 {offsets = [8, 0, 0], sizes = [4, 8, 8], strides = [1, 1, 1]} : vector<12x8x8xf32> to vector<4x8x8xf32>
    %188 = arith.truncf %185 : vector<4x8x8xf32> to vector<4x8x8xbf16>
    %189 = arith.truncf %186 : vector<4x8x8xf32> to vector<4x8x8xbf16>
    "tpu.trace_start"() <{level = 10 : i32, message = "hqd,hkd->hqk"}> : () -> ()
    %cst_92 = arith.constant dense<0.000000e+00> : vector<4x8x8xf32>
    %190 = tpu.matmul %188, %189, %cst_92 {dimension_numbers = #tpu.dot_dimension_numbers<[2], [2], [1], [1], [0, 0, 0, 1, 1, 1], [0], [0]>} : vector<4x8x8xbf16>, vector<4x8x8xbf16>, vector<4x8x8xf32> -> vector<4x8x8xf32>
    "tpu.trace_stop"() : () -> ()
    %cst_93 = arith.constant 0.353553385 : f32
    %191 = vector.broadcast %cst_93 : f32 to vector<4x8x8xf32>
    %192 = arith.mulf %190, %191 : vector<4x8x8xf32>
    %193 = vector.broadcast %48 : vector<1x1x8xf32> to vector<4x8x8xf32>
    %194 = arith.addf %192, %193 : vector<4x8x8xf32>
    %cst_94 = arith.constant dense<0xFF800000> : vector<4x8xf32>
    %195 = vector.multi_reduction <maximumf>, %194, %cst_94 [2] : vector<4x8x8xf32> to vector<4x8xf32>
    %196 = vector.shape_cast %195 : vector<4x8xf32> to vector<4x8x1xf32>
    %197 = vector.broadcast %196 : vector<4x8x1xf32> to vector<4x8x8xf32>
    %198 = arith.subf %194, %197 : vector<4x8x8xf32>
    %199 = math.exp %198 : vector<4x8x8xf32>
    %cst_95 = arith.constant dense<0.000000e+00> : vector<4x8xf32>
    %200 = vector.multi_reduction <add>, %199, %cst_95 [2] : vector<4x8x8xf32> to vector<4x8xf32>
    %201 = vector.shape_cast %200 : vector<4x8xf32> to vector<4x8x1xf32>
    %202 = vector.broadcast %201 : vector<4x8x1xf32> to vector<4x8x8xf32>
    %203 = arith.divf %199, %202 : vector<4x8x8xf32>
    %204 = arith.truncf %203 : vector<4x8x8xf32> to vector<4x8x8xbf16>
    %205 = arith.truncf %187 : vector<4x8x8xf32> to vector<4x8x8xbf16>
    "tpu.trace_start"() <{level = 10 : i32, message = "hqk,hkd->hqd"}> : () -> ()
    %cst_96 = arith.constant dense<0.000000e+00> : vector<4x8x8xf32>
    %206 = tpu.matmul %204, %205, %cst_96 {dimension_numbers = #tpu.dot_dimension_numbers<[2], [1], [1], [2], [0, 0, 0, 1, 1, 2], [0], [0]>} : vector<4x8x8xbf16>, vector<4x8x8xbf16>, vector<4x8x8xf32> -> vector<4x8x8xf32>
    "tpu.trace_stop"() : () -> ()
    %207 = arith.truncf %206 : vector<4x8x8xf32> to vector<4x8x8xbf16>
    %c1_97 = arith.constant 1 : index
    %c0_98 = arith.constant 0 : index
    %c0_99 = arith.constant 0 : index
    %c0_100 = arith.constant 0 : index
    %208 = vector.load %arg11[%c1_97, %c0_98, %c0_99, %c0_100] : memref<2x4x8x32xbf16, #tpu.memory_space<vmem>>, vector<1x4x8x32xbf16>
    %209 = vector.shape_cast %208 : vector<1x4x8x32xbf16> to vector<4x8x32xbf16>
    "tpu.trace_start"() <{level = 10 : i32, message = "hqd,hdo->hqo"}> : () -> ()
    %cst_101 = arith.constant dense<0.000000e+00> : vector<4x8x32xf32>
    %210 = tpu.matmul %207, %209, %cst_101 {dimension_numbers = #tpu.dot_dimension_numbers<[2], [1], [1], [2], [0, 0, 0, 1, 1, 2], [0], [0]>} : vector<4x8x8xbf16>, vector<4x8x32xbf16>, vector<4x8x32xf32> -> vector<4x8x32xf32>
    "tpu.trace_stop"() : () -> ()
    %cst_102 = arith.constant dense<0.000000e+00> : vector<8x32xf32>
    %211 = vector.multi_reduction <add>, %210, %cst_102 [0] : vector<4x8x32xf32> to vector<8x32xf32>
    %c1_103 = arith.constant 1 : index
    %c0_104 = arith.constant 0 : index
    %c0_105 = arith.constant 0 : index
    %212 = vector.load %arg12[%c1_103, %c0_104, %c0_105] : memref<2x1x32xf32, #tpu.memory_space<vmem>>, vector<1x1x32xf32>
    %213 = vector.shape_cast %212 : vector<1x1x32xf32> to vector<1x32xf32>
    %214 = vector.broadcast %213 : vector<1x32xf32> to vector<8x32xf32>
    %215 = arith.addf %211, %214 : vector<8x32xf32>
    %216 = arith.addf %215, %173 : vector<8x32xf32>
    %c1_106 = arith.constant 1 : index
    %c0_107 = arith.constant 0 : index
    %c0_108 = arith.constant 0 : index
    %217 = vector.load %arg13[%c1_106, %c0_107, %c0_108] : memref<2x1x32xf32, #tpu.memory_space<vmem>>, vector<1x1x32xf32>
    %218 = vector.shape_cast %217 : vector<1x1x32xf32> to vector<1x32xf32>
    %c1_109 = arith.constant 1 : index
    %c0_110 = arith.constant 0 : index
    %c0_111 = arith.constant 0 : index
    %219 = vector.load %arg14[%c1_109, %c0_110, %c0_111] : memref<2x1x32xf32, #tpu.memory_space<vmem>>, vector<1x1x32xf32>
    %220 = vector.shape_cast %219 : vector<1x1x32xf32> to vector<1x32xf32>
    %cst_112 = arith.constant dense<0.000000e+00> : vector<8xf32>
    %221 = vector.multi_reduction <add>, %216, %cst_112 [1] : vector<8x32xf32> to vector<8xf32>
    %222 = vector.shape_cast %221 : vector<8xf32> to vector<8x1xf32>
    %cst_113 = arith.constant 3.200000e+01 : f32
    %223 = vector.broadcast %cst_113 : f32 to vector<8x1xf32>
    %224 = arith.divf %222, %223 : vector<8x1xf32>
    %225 = vector.broadcast %224 : vector<8x1xf32> to vector<8x32xf32>
    %226 = arith.subf %216, %225 : vector<8x32xf32>
    %227 = arith.mulf %226, %226 : vector<8x32xf32>
    %cst_114 = arith.constant dense<0.000000e+00> : vector<8xf32>
    %228 = vector.multi_reduction <add>, %227, %cst_114 [1] : vector<8x32xf32> to vector<8xf32>
    %229 = vector.shape_cast %228 : vector<8xf32> to vector<8x1xf32>
    %cst_115 = arith.constant 3.200000e+01 : f32
    %230 = vector.broadcast %cst_115 : f32 to vector<8x1xf32>
    %231 = arith.divf %229, %230 : vector<8x1xf32>
    %232 = vector.broadcast %224 : vector<8x1xf32> to vector<8x32xf32>
    %233 = arith.subf %216, %232 : vector<8x32xf32>
    %cst_116 = arith.constant 9.99999996E-13 : f32
    %234 = vector.broadcast %cst_116 : f32 to vector<8x1xf32>
    %235 = arith.addf %231, %234 : vector<8x1xf32>
    %236 = math.rsqrt %235 : vector<8x1xf32>
    %237 = vector.broadcast %236 : vector<8x1xf32> to vector<8x32xf32>
    %238 = arith.mulf %233, %237 : vector<8x32xf32>
    %239 = vector.broadcast %218 : vector<1x32xf32> to vector<8x32xf32>
    %240 = arith.mulf %238, %239 : vector<8x32xf32>
    %241 = vector.broadcast %220 : vector<1x32xf32> to vector<8x32xf32>
    %242 = arith.addf %240, %241 : vector<8x32xf32>
    %243 = arith.truncf %242 : vector<8x32xf32> to vector<8x32xbf16>
    %c1_117 = arith.constant 1 : index
    %c0_118 = arith.constant 0 : index
    %c0_119 = arith.constant 0 : index
    %244 = vector.load %arg15[%c1_117, %c0_118, %c0_119] : memref<2x32x64xbf16, #tpu.memory_space<vmem>>, vector<1x32x64xbf16>
    %245 = vector.shape_cast %244 : vector<1x32x64xbf16> to vector<32x64xbf16>
    %cst_120 = arith.constant dense<0.000000e+00> : vector<8x64xf32>
    %246 = tpu.matmul %243, %245, %cst_120 {dimension_numbers = #tpu.dot_dimension_numbers<[1], [0], [0], [1], [0, 0, 1, 1], [], []>} : vector<8x32xbf16>, vector<32x64xbf16>, vector<8x64xf32> -> vector<8x64xf32>
    %c1_121 = arith.constant 1 : index
    %c0_122 = arith.constant 0 : index
    %c0_123 = arith.constant 0 : index
    %247 = vector.load %arg16[%c1_121, %c0_122, %c0_123] : memref<2x1x64xf32, #tpu.memory_space<vmem>>, vector<1x1x64xf32>
    %248 = vector.shape_cast %247 : vector<1x1x64xf32> to vector<1x64xf32>
    %249 = vector.broadcast %248 : vector<1x64xf32> to vector<8x64xf32>
    %250 = arith.addf %246, %249 : vector<8x64xf32>
    %251 = arith.mulf %250, %250 : vector<8x64xf32>
    %252 = arith.mulf %250, %251 : vector<8x64xf32>
    %cst_124 = arith.constant 4.471500e-02 : f32
    %253 = vector.broadcast %cst_124 : f32 to vector<8x64xf32>
    %254 = arith.mulf %253, %252 : vector<8x64xf32>
    %255 = arith.addf %250, %254 : vector<8x64xf32>
    %cst_125 = arith.constant 0.797884583 : f32
    %256 = vector.broadcast %cst_125 : f32 to vector<8x64xf32>
    %257 = arith.mulf %256, %255 : vector<8x64xf32>
    %258 = math.tanh %257 : vector<8x64xf32>
    %cst_126 = arith.constant 1.000000e+00 : f32
    %259 = vector.broadcast %cst_126 : f32 to vector<8x64xf32>
    %260 = arith.addf %259, %258 : vector<8x64xf32>
    %cst_127 = arith.constant 5.000000e-01 : f32
    %261 = vector.broadcast %cst_127 : f32 to vector<8x64xf32>
    %262 = arith.mulf %261, %260 : vector<8x64xf32>
    %263 = arith.mulf %250, %262 : vector<8x64xf32>
    %264 = arith.truncf %263 : vector<8x64xf32> to vector<8x64xbf16>
    %c1_128 = arith.constant 1 : index
    %c0_129 = arith.constant 0 : index
    %c0_130 = arith.constant 0 : index
    %265 = vector.load %arg17[%c1_128, %c0_129, %c0_130] : memref<2x64x32xbf16, #tpu.memory_space<vmem>>, vector<1x64x32xbf16>
    %266 = vector.shape_cast %265 : vector<1x64x32xbf16> to vector<64x32xbf16>
    %cst_131 = arith.constant dense<0.000000e+00> : vector<8x32xf32>
    %267 = tpu.matmul %264, %266, %cst_131 {dimension_numbers = #tpu.dot_dimension_numbers<[1], [0], [0], [1], [0, 0, 1, 1], [], []>} : vector<8x64xbf16>, vector<64x32xbf16>, vector<8x32xf32> -> vector<8x32xf32>
    %c1_132 = arith.constant 1 : index
    %c0_133 = arith.constant 0 : index
    %c0_134 = arith.constant 0 : index
    %268 = vector.load %arg18[%c1_132, %c0_133, %c0_134] : memref<2x1x32xf32, #tpu.memory_space<vmem>>, vector<1x1x32xf32>
    %269 = vector.shape_cast %268 : vector<1x1x32xf32> to vector<1x32xf32>
    %270 = vector.broadcast %269 : vector<1x32xf32> to vector<8x32xf32>
    %271 = arith.addf %267, %270 : vector<8x32xf32>
    %272 = arith.addf %271, %242 : vector<8x32xf32>
    %c1_135 = arith.constant 1 : index
    %c0_136 = arith.constant 0 : index
    %c0_137 = arith.constant 0 : index
    %273 = vector.load %arg19[%c1_135, %c0_136, %c0_137] : memref<2x1x32xf32, #tpu.memory_space<vmem>>, vector<1x1x32xf32>
    %274 = vector.shape_cast %273 : vector<1x1x32xf32> to vector<1x32xf32>
    %c1_138 = arith.constant 1 : index
    %c0_139 = arith.constant 0 : index
    %c0_140 = arith.constant 0 : index
    %275 = vector.load %arg20[%c1_138, %c0_139, %c0_140] : memref<2x1x32xf32, #tpu.memory_space<vmem>>, vector<1x1x32xf32>
    %276 = vector.shape_cast %275 : vector<1x1x32xf32> to vector<1x32xf32>
    %cst_141 = arith.constant dense<0.000000e+00> : vector<8xf32>
    %277 = vector.multi_reduction <add>, %272, %cst_141 [1] : vector<8x32xf32> to vector<8xf32>
    %278 = vector.shape_cast %277 : vector<8xf32> to vector<8x1xf32>
    %cst_142 = arith.constant 3.200000e+01 : f32
    %279 = vector.broadcast %cst_142 : f32 to vector<8x1xf32>
    %280 = arith.divf %278, %279 : vector<8x1xf32>
    %281 = vector.broadcast %280 : vector<8x1xf32> to vector<8x32xf32>
    %282 = arith.subf %272, %281 : vector<8x32xf32>
    %283 = arith.mulf %282, %282 : vector<8x32xf32>
    %cst_143 = arith.constant dense<0.000000e+00> : vector<8xf32>
    %284 = vector.multi_reduction <add>, %283, %cst_143 [1] : vector<8x32xf32> to vector<8xf32>
    %285 = vector.shape_cast %284 : vector<8xf32> to vector<8x1xf32>
    %cst_144 = arith.constant 3.200000e+01 : f32
    %286 = vector.broadcast %cst_144 : f32 to vector<8x1xf32>
    %287 = arith.divf %285, %286 : vector<8x1xf32>
    %288 = vector.broadcast %280 : vector<8x1xf32> to vector<8x32xf32>
    %289 = arith.subf %272, %288 : vector<8x32xf32>
    %cst_145 = arith.constant 9.99999996E-13 : f32
    %290 = vector.broadcast %cst_145 : f32 to vector<8x1xf32>
    %291 = arith.addf %287, %290 : vector<8x1xf32>
    %292 = math.rsqrt %291 : vector<8x1xf32>
    %293 = vector.broadcast %292 : vector<8x1xf32> to vector<8x32xf32>
    %294 = arith.mulf %289, %293 : vector<8x32xf32>
    %295 = vector.broadcast %274 : vector<1x32xf32> to vector<8x32xf32>
    %296 = arith.mulf %294, %295 : vector<8x32xf32>
    %297 = vector.broadcast %276 : vector<1x32xf32> to vector<8x32xf32>
    %298 = arith.addf %296, %297 : vector<8x32xf32>
    %299 = vector.extract_strided_slice %298 {offsets = [0, 0], sizes = [1, 32], strides = [1, 1]} : vector<8x32xf32> to vector<1x32xf32>
    %300 = arith.truncf %299 : vector<1x32xf32> to vector<1x32xbf16>
    %c0_146 = arith.constant 0 : index
    %c0_147 = arith.constant 0 : index
    %301 = vector.load %arg21[%c0_146, %c0_147] : memref<32x16xbf16, #tpu.memory_space<vmem>>, vector<32x16xbf16>
    %cst_148 = arith.constant dense<0.000000e+00> : vector<1x16xf32>
    %302 = tpu.matmul %300, %301, %cst_148 {dimension_numbers = #tpu.dot_dimension_numbers<[1], [0], [0], [1], [0, 0, 1, 1], [], []>} : vector<1x32xbf16>, vector<32x16xbf16>, vector<1x16xf32> -> vector<1x16xf32>
    %c0_149 = arith.constant 0 : index
    %c0_150 = arith.constant 0 : index
    %303 = vector.load %arg22[%c0_149, %c0_150] : memref<1x16xf32, #tpu.memory_space<vmem>>, vector<1x16xf32>
    %304 = arith.addf %302, %303 : vector<1x16xf32>
    %305 = math.tanh %304 : vector<1x16xf32>
    %c0_151 = arith.constant 0 : index
    %c0_152 = arith.constant 0 : index
    %c0_153 = arith.constant 0 : index
    %306 = vector.load %arg23[%c0_151, %c0_152, %c0_153] : memref<1x1x16xf32, #tpu.memory_space<vmem>>, vector<1x1x16xf32>
    %307 = vector.shape_cast %306 : vector<1x1x16xf32> to vector<1x16xf32>
    %308 = vector.shape_cast %305 : vector<1x16xf32> to vector<1x1x16xf32>
    tpu.vector_store %arg23[%c0_151, %c0_152, %c0_153], %308 {strides = array<i32>} : memref<1x1x16xf32, #tpu.memory_space<vmem>>, vector<1x1x16xf32>,
    return
  }
  func.func @transform_0(%arg0: i32) -> (i32, i32) {
    %c0_i32 = arith.constant 0 : i32
    %c0_i32_0 = arith.constant 0 : i32
    return %arg0, %c0_i32 : i32, i32
  }
  func.func @transform_1(%arg0: i32) -> (i32, i32) {
    %c0_i32 = arith.constant 0 : i32
    %c0_i32_0 = arith.constant 0 : i32
    return %arg0, %c0_i32 : i32, i32
  }
  func.func @transform_2(%arg0: i32) -> (i32, i32, i32) {
    %c0_i32 = arith.constant 0 : i32
    %c0_i32_0 = arith.constant 0 : i32
    %c0_i32_1 = arith.constant 0 : i32
    return %arg0, %c0_i32, %c0_i32_0 : i32, i32, i32
  }
  func.func @transform_3(%arg0: i32) -> (i32, i32) {
    %c0_i32 = arith.constant 0 : i32
    %c0_i32_0 = arith.constant 0 : i32
    %c0_i32_1 = arith.constant 0 : i32
    return %c0_i32, %c0_i32_0 : i32, i32
  }
  func.func @transform_4(%arg0: i32) -> (i32, i32) {
    %c0_i32 = arith.constant 0 : i32
    %c0_i32_0 = arith.constant 0 : i32
    %c0_i32_1 = arith.constant 0 : i32
    return %c0_i32, %c0_i32_0 : i32, i32
  }
  func.func @transform_5(%arg0: i32) -> (i32, i32) {
    %c0_i32 = arith.constant 0 : i32
    %c0_i32_0 = arith.constant 0 : i32
    %c0_i32_1 = arith.constant 0 : i32
    return %c0_i32, %c0_i32_0 : i32, i32
  }
  func.func @transform_6(%arg0: i32) -> (i32, i32) {
    %c0_i32 = arith.constant 0 : i32
    %c0_i32_0 = arith.constant 0 : i32
    %c0_i32_1 = arith.constant 0 : i32
    return %c0_i32, %c0_i32_0 : i32, i32
  }
  func.func @transform_7(%arg0: i32) -> (i32, i32) {
    %c0_i32 = arith.constant 0 : i32
    %c0_i32_0 = arith.constant 0 : i32
    %c0_i32_1 = arith.constant 0 : i32
    return %c0_i32, %c0_i32_0 : i32, i32
  }
  func.func @transform_8(%arg0: i32) -> (i32, i32, i32, i32) {
    %c0_i32 = arith.constant 0 : i32
    %c0_i32_0 = arith.constant 0 : i32
    %c0_i32_1 = arith.constant 0 : i32
    %c0_i32_2 = arith.constant 0 : i32
    %c0_i32_3 = arith.constant 0 : i32
    return %c0_i32, %c0_i32_0, %c0_i32_1, %c0_i32_2 : i32, i32, i32, i32
  }
  func.func @transform_9(%arg0: i32) -> (i32, i32, i32, i32) {
    %c0_i32 = arith.constant 0 : i32
    %c0_i32_0 = arith.constant 0 : i32
    %c0_i32_1 = arith.constant 0 : i32
    %c0_i32_2 = arith.constant 0 : i32
    %c0_i32_3 = arith.constant 0 : i32
    return %c0_i32, %c0_i32_0, %c0_i32_1, %c0_i32_2 : i32, i32, i32, i32
  }
  func.func @transform_10(%arg0: i32) -> (i32, i32, i32, i32) {
    %c0_i32 = arith.constant 0 : i32
    %c0_i32_0 = arith.constant 0 : i32
    %c0_i32_1 = arith.constant 0 : i32
    %c0_i32_2 = arith.constant 0 : i32
    %c0_i32_3 = arith.constant 0 : i32
    return %c0_i32, %c0_i32_0, %c0_i32_1, %c0_i32_2 : i32, i32, i32, i32
  }
  func.func @transform_11(%arg0: i32) -> (i32, i32, i32) {
    %c0_i32 = arith.constant 0 : i32
    %c0_i32_0 = arith.constant 0 : i32
    %c0_i32_1 = arith.constant 0 : i32
    %c0_i32_2 = arith.constant 0 : i32
    return %c0_i32, %c0_i32_0, %c0_i32_1 : i32, i32, i32
  }
  func.func @transform_12(%arg0: i32) -> (i32, i32, i32) {
    %c0_i32 = arith.constant 0 : i32
    %c0_i32_0 = arith.constant 0 : i32
    %c0_i32_1 = arith.constant 0 : i32
    %c0_i32_2 = arith.constant 0 : i32
    return %c0_i32, %c0_i32_0, %c0_i32_1 : i32, i32, i32
  }
  func.func @transform_13(%arg0: i32) -> (i32, i32, i32) {
    %c0_i32 = arith.constant 0 : i32
    %c0_i32_0 = arith.constant 0 : i32
    %c0_i32_1 = arith.constant 0 : i32
    %c0_i32_2 = arith.constant 0 : i32
    return %c0_i32, %c0_i32_0, %c0_i32_1 : i32, i32, i32
  }
  func.func @transform_14(%arg0: i32) -> (i32, i32, i32) {
    %c0_i32 = arith.constant 0 : i32
    %c0_i32_0 = arith.constant 0 : i32
    %c0_i32_1 = arith.constant 0 : i32
    %c0_i32_2 = arith.constant 0 : i32
    return %c0_i32, %c0_i32_0, %c0_i32_1 : i32, i32, i32
  }
  func.func @transform_15(%arg0: i32) -> (i32, i32, i32) {
    %c0_i32 = arith.constant 0 : i32
    %c0_i32_0 = arith.constant 0 : i32
    %c0_i32_1 = arith.constant 0 : i32
    %c0_i32_2 = arith.constant 0 : i32
    return %c0_i32, %c0_i32_0, %c0_i32_1 : i32, i32, i32
  }
  func.func @transform_16(%arg0: i32) -> (i32, i32, i32) {
    %c0_i32 = arith.constant 0 : i32
    %c0_i32_0 = arith.constant 0 : i32
    %c0_i32_1 = arith.constant 0 : i32
    %c0_i32_2 = arith.constant 0 : i32
    return %c0_i32, %c0_i32_0, %c0_i32_1 : i32, i32, i32
  }
  func.func @transform_17(%arg0: i32) -> (i32, i32, i32) {
    %c0_i32 = arith.constant 0 : i32
    %c0_i32_0 = arith.constant 0 : i32
    %c0_i32_1 = arith.constant 0 : i32
    %c0_i32_2 = arith.constant 0 : i32
    return %c0_i32, %c0_i32_0, %c0_i32_1 : i32, i32, i32
  }
  func.func @transform_18(%arg0: i32) -> (i32, i32, i32) {
    %c0_i32 = arith.constant 0 : i32
    %c0_i32_0 = arith.constant 0 : i32
    %c0_i32_1 = arith.constant 0 : i32
    %c0_i32_2 = arith.constant 0 : i32
    return %c0_i32, %c0_i32_0, %c0_i32_1 : i32, i32, i32
  }
  func.func @transform_19(%arg0: i32) -> (i32, i32, i32) {
    %c0_i32 = arith.constant 0 : i32
    %c0_i32_0 = arith.constant 0 : i32
    %c0_i32_1 = arith.constant 0 : i32
    %c0_i32_2 = arith.constant 0 : i32
    return %c0_i32, %c0_i32_0, %c0_i32_1 : i32, i32, i32
  }
  func.func @transform_20(%arg0: i32) -> (i32, i32) {
    %c0_i32 = arith.constant 0 : i32
    %c0_i32_0 = arith.constant 0 : i32
    %c0_i32_1 = arith.constant 0 : i32
    return %c0_i32, %c0_i32_0 : i32, i32
  }
  func.func @transform_21(%arg0: i32) -> (i32, i32) {
    %c0_i32 = arith.constant 0 : i32
    %c0_i32_0 = arith.constant 0 : i32
    %c0_i32_1 = arith.constant 0 : i32
    return %c0_i32, %c0_i32_0 : i32, i32
  }
  func.func @transform_22(%arg0: i32) -> (i32, i32, i32) {
    %c0_i32 = arith.constant 0 : i32
    %c0_i32_0 = arith.constant 0 : i32
    %c0_i32_1 = arith.constant 0 : i32
    return %arg0, %c0_i32, %c0_i32_0 : i32, i32, i32
  }
}

</mosaic_0001>

<bundles_post_ra>
// kernel: bert_text_net.1
= control target key start
LH: loop header
LB: loop body
LE: loop exit
PB: predicated region body
PF: predicated region fallthrough
CT: control target
= control target key end

     0   :  { %s6235_s0 = inlined_call_operand.vmem [shape: s32[16,1], index: 0, kind: input, shape index: {}]   ;;  %s6236_s1 = inlined_call_operand.vmem [shape: s32[16,1], index: 1, kind: input, shape index: {}]   ;;  %s6237_s2 = inlined_call_operand.vmem [shape: f32[2,1,8], index: 2, kind: input, shape index: {}]   ;;  %s6238_s3 = inlined_call_operand.vmem [shape: f32[8,32], index: 3, kind: input, shape index: {}]   ;;  %s6239_s4 = inlined_call_operand.vmem [shape: bf16[50,32], index: 4, kind: input, shape index: {}]   ;;  %s6240_s5 = inlined_call_operand.vmem [shape: f32[2,32], index: 5, kind: input, shape index: {}]   ;;  %s6241_s6 = inlined_call_operand.vmem [shape: f32[1,32], index: 6, kind: input, shape index: {}]   ;;  %s6242_s7 = inlined_call_operand.vmem [shape: f32[1,32], index: 7, kind: input, shape index: {}]   ;;  %s6243_s8 = inlined_call_operand.vmem [shape: bf16[2,12,32,8], index: 8, kind: input, shape index: {}]   ;;  %s6244_s9 = inlined_call_operand.vmem [shape: f32[2,12,1,8], index: 9, kind: input, shape index: {}]   ;;  %s6245_s10 = inlined_call_operand.vmem [shape: bf16[2,4,8,32], index: 10, kind: input, shape index: {}]   ;;  %s6246_s11 = inlined_call_operand.vmem [shape: f32[2,1,32], index: 11, kind: input, shape index: {}]   ;;  %s6247_s12 = inlined_call_operand.vmem [shape: f32[2,1,32], index: 12, kind: input, shape index: {}]   ;;  %s6248_s13 = inlined_call_operand.vmem [shape: f32[2,1,32], index: 13, kind: input, shape index: {}]   ;;  %s6249_s14 = inlined_call_operand.vmem [shape: bf16[2,32,64], index: 14, kind: input, shape index: {}]   ;;  %s6250_s15 = inlined_call_operand.vmem [shape: f32[2,1,64], index: 15, kind: input, shape index: {}]   ;;  %s6251_s16 = inlined_call_operand.vmem [shape: bf16[2,64,32], index: 16, kind: input, shape index: {}]   ;;  %s6252_s17 = inlined_call_operand.vmem [shape: f32[2,1,32], index: 17, kind: input, shape index: {}]   ;;  %s6253_s18 = inlined_call_operand.vmem [shape: f32[2,1,32], index: 18, kind: input, shape index: {}]   ;;  %s6254_s19 = inlined_call_operand.vmem [shape: f32[2,1,32], index: 19, kind: input, shape index: {}]   ;;  %s6255_s20 = inlined_call_operand.vmem [shape: bf16[32,16], index: 20, kind: input, shape index: {}]   ;;  %s6256_s21 = inlined_call_operand.vmem [shape: f32[1,16], index: 21, kind: input, shape index: {}]   ;;  %s6257_s22 = inlined_call_operand.hbm [shape: f32[2,1,16], index: 22, kind: output, shape index: {}]  }
   0x1   :  { %6269 = sst [smem:[#allocation13_spill]] %s6235_s0 }
   0x2   :  { %6270 = sst [smem:[#allocation14_spill]] %s6236_s1 }
   0x3   :  { %6271 = sst [smem:[#allocation15_spill]] %s6237_s2 }
   0x4   :  { %6272 = sst [smem:[#allocation16_spill]] %s6238_s3 }
   0x5   :  { %6273 = sst [smem:[#allocation17_spill]] %s6239_s4 }
   0x6   :  { %6274 = sst [smem:[#allocation18_spill]] %s6240_s5 }
   0x7   :  { %6275 = sst [smem:[#allocation19_spill]] %s6241_s6 }
   0x8   :  { %6276 = sst [smem:[#allocation20_spill]] %s6256_s21 }
   0x9   :  { %6277 = sst [smem:[#allocation21_spill]] %s6257_s22 }
   0xa   :  { %27 = vsyncpa [#allocation3], 0 }
   0xb   :  { %29 = vsyncpa [#allocation3 + $0x1], 0  ;;  %s5404_s3 = smov 0   ;;  %s5406_s28 = smov 0  }
   0xc   :  { %s5408_s29 = smov 0   ;;  %s5410_s30 = smov 0  }
   0xd LB: > { %6278 = sst [smem:[#allocation5_spill]] %s5271_s3  ;;  %s5425_s4 = sadd.s32 4294967295, %s5283_s30   ;;  %s5283_s30 = sphi %s5410_s30, %s6302_s30   ;;  %s5279_s29 = sphi %s5408_s29, %s6304_s29   ;;  %s5275_s28 = sphi %s5406_s28, %s6306_s28   ;;  %s5271_s3 = sphi %s5404_s3, %s6305_s3  }
   0xe   : > { %6279 = sst [smem:[#allocation6_spill]] %s5279_s29  ;;  %s4270_s0 = sadd.s32 4294967294, %s5283_s30  }
   0xf   : > { %6280 = sst [smem:[#allocation7_spill]] %s5283_s30  ;;  %s5429_s23 = sadd.s32 1, %s5283_s30  }
  0x10   : > { %6281 = sst [smem:[#allocation8_spill]] %s5425_s4  ;;  %s519_s1 = sadd.s32 1, %s5279_s29 }
  0x11   : > { %6282 = sst [smem:[#allocation9_spill]] %s5429_s23  ;;  %s516_s5 = ssub.s32 %s5283_s30, %s5429_s23 }
  0x12   : > { %p529_p0 = scmp.ne.s32.totalorder %s5279_s29, %s5275_s28  ;;  %p517_p1 = scmp.eq.s32.totalorder %s516_s5, 0 }
  0x13   : > { %p530_p2 = scmp.eq.s32.totalorder %s5425_s4, 1  ;;  %p535_p3 = scmp.ne.s32.totalorder %s5275_s28, %s5271_s3 }
  0x14   : > { %p536_p4 = scmp.eq.s32.totalorder %s4270_s0, 1  ;;  %p4273_p7 = scmp.ge.s32.totalorder %s5283_s30, 1 }
  0x15   : > { %s5440_s24 = scalar_select %p517_p1, %s5279_s29, %s519_s1  }
  0x16   : > { %p5442_p5 = por %p530_p2, %p529_p0  ;;  %p5446_p6 = por %p536_p4, %p535_p3 }
  0x17   : > { %6283 = sst [smem:[#allocation10_spill]] %s5440_s24  ;;  %p631_p8 = scmp.lt.s32.totalorder %s5283_s30, 3 }
  0x18   : > { %s6284_s6 = scalar_select %p5442_p5, 1, 0 }
  0x19   : > { %s6286_s25 = scalar_select %p5446_p6, 1, 0 }
  0x1a   : > { %6285 = sst [smem:[#allocation11_spill]] %s6284_s6  ;;  %p632_p9 = pnand %p4273_p7, %p631_p8 }
  0x1b   : > { %6287 = sst [smem:[#allocation12_spill]] %s6286_s25  ;;  %p698_p10 = scmp.lt.s32.totalorder (!%p632_p9), %s5425_s4, 1  ;;  %v5285_v1 = vmov (!%p632_p9), 0   ;;  %v5286_v2 = vmov (!%p632_p9), 0.0   ;;  %vm756_vm0 = vcmask (!%p632_p9), 1040384   ;;  %vm5287_vm1 = vmmov (!%p632_p9), 0  }
  0x1c   : > { %635 = sbr.rel (%p632_p9) target bundleno = 5564 (0x15bc), region = 108  ;;  %s6288_s27 = sld [smem:[#allocation17_spill]] (!%p632_p9)  ;;  %5106 = vset.pattern.permute.xlu0 (!%p632_p9), %v5285_v1  ;;  %4668 = vmatprep.subr.bf16.mxu0 (!%p632_p9), %v5286_v2  ;;  %v711_v10 = vlaneseq (!%p632_p9)  ;;  %vm752_vm3 = vcmask (!%p632_p9), 408576   ;;  %vm822_vm4 = vcmask (!%p632_p9), 261120   ;;  %v5111_v39 = vld [vmem:[%s6243_s8] sm:$0xff] (!%p632_p9)   ;;  %v5113_v41 = vld [vmem:[%s6243_s8 + $0x8] sm:$0xff] (!%p632_p9)  }
  0x1d   : > { %4680 = vmatprep.subr.bf16.mxu1 (!%p632_p9), %v5286_v2  ;;  %s6289_s29 = sld [smem:[#allocation13_spill]] (!%p632_p9)  ;;  %s6290_s30 = sld [smem:[#allocation14_spill]] (!%p632_p9)  ;;  %4676 = vmatprep.mubr.msk.bf16.mxu0 (!%p632_p9), %vm5287_vm1, %v5286_v2  ;;  %v5112_v40 = vld [vmem:[%s6243_s8 + $0x20] sm:$0xff] (!%p632_p9)   ;;  %v5114_v42 = vld [vmem:[%s6243_s8 + $0x28] sm:$0xff] (!%p632_p9)   ;;  %v5115_v52 = vld [vmem:[%s6243_s8 + $0x10] sm:$0xff] (!%p632_p9)   ;;  %vm1620_vm5 = vcmask (!%p632_p9), 64512  }
  0x1e   : > { %4684 = vmatprep.mubr.msk.bf16.mxu1 (!%p632_p9), %vm5287_vm1, %v5286_v2  ;;  %v712_v11 = vand.u32 (!%p632_p9), 127, %v711_v10  ;;  %s6291_s3 = sld [smem:[#allocation18_spill]] (!%p632_p9)  ;;  %v801_v16 = vshrl.u32 (!%p632_p9), %v711_v10, 7  ;;  %4681 = vmatpush3.bf16.msra.mxu1 (!%p632_p9), %v5111_v39  ;;  %v4283_v49 = vld [vmem:[%s6242_s7] ss:$0 sm:$0xff] (!%p632_p9)  ;;  %v5117_v55 = vld [vmem:[%s6243_s8 + $0x18] sm:$0xff] (!%p632_p9)  }
  0x1f   : > { %4682 = vmatprep.subr.bf16.mxu1 (!%p632_p9), %v5286_v2  ;;  %v5116_v53 = vld [vmem:[%s6243_s8 + $0x40] sm:$0xff] (!%p632_p9)   ;;  %v5118_v56 = vld [vmem:[%s6243_s8 + $0x48] sm:$0xff] (!%p632_p9)   ;;  %v5119_v57 = vld [vmem:[%s6243_s8 + $0x30] sm:$0xff] (!%p632_p9)   ;;  %vm1874_vm6 = vcmask (!%p632_p9), 1043456   ;;  %s6294_s26 = sld [smem:[#allocation15_spill]] (!%p632_p9)  ;;  %vm2409_vm7 = vcmask (!%p632_p9), 523264  }
  0x20   : > { %v816_v19 = vsub.s32 (!%p632_p9), 1, %v801_v16  ;;  %v802_v20 = vsub.s32 (!%p632_p9), 0, %v801_v16  ;;  %v5120_v58 = vld [vmem:[%s6243_s8 + $0x60] sm:$0xff] (!%p632_p9)   ;;  %v5121_v59 = vld [vmem:[%s6243_s8 + $0x38] sm:$0xff] (!%p632_p9)   ;;  %v5122_v60 = vld [vmem:[%s6243_s8 + $0x68] sm:$0xff] (!%p632_p9)   ;;  %s6295_s25 = sld [smem:[#allocation8_spill]] (!%p632_p9) }
  0x21   : > { %v5123_v61 = vld [vmem:[%s6243_s8 + $0x50] sm:$0xff] (!%p632_p9)   ;;  %v5124_v62 = vld [vmem:[%s6243_s8 + $0x80] sm:$0xff] (!%p632_p9)   ;;  %v5125_v63 = vld [vmem:[%s6243_s8 + $0x58] sm:$0xff] (!%p632_p9)   ;;  %s6296_s1 = sld [smem:[#allocation20_spill]] (!%p632_p9)  ;;  %vm4179_vm8 = vcmask (!%p632_p9), 122880  }
  0x22   : > { %v5107_v0 = vld [vmem:[%s6288_s27] sm:$0xff] (!%p632_p9)   ;;  %v5108_v3 = vld [vmem:[%s6288_s27 + $0x8] sm:$0xff] (!%p632_p9)   ;;  %v5109_v4 = vld [vmem:[%s6288_s27 + $0x10] sm:$0xff] (!%p632_p9)   ;;  %4683 = vmatpush3.bf16.msra.mxu1 (!%p632_p9), %v5113_v41 }
  0x23   : > { %s5458_s0 = scalar_select %p698_p10, %s5425_s4, 1  ;;  %4669 = vmatpush3.bf16.msra.mxu0 %v5107_v0  ;;  %v5110_v5 = vld [vmem:[%s6288_s27 + $0x18] ss:$0 sps:$4 sm:$0x11]   ;;  %4688 = vmatprep.subr.bf16.mxu1 %v5286_v2  ;;  %v5126_v0 = vld [vmem:[%s6243_s8 + $0x88] sm:$0xff]   ;;  %v5127_v1 = vld [vmem:[%s6243_s8 + $0x70] sm:$0xff]  }
  0x24   : > { %4670 = vmatprep.subr.bf16.mxu0 %v5286_v2  ;;  %v758_v9 = vsel %vm756_vm0, %v5110_v5, 0  ;;  %v727_v15 = vld [vmem:[%s6291_s3] sm:$0x3]  ;;  %s6292_s4 = sld [smem:[#allocation16_spill]]  ;;  %s6293_s3 = sld [smem:[#allocation19_spill]]  ;;  %v5130_v5 = vld [vmem:[%s6243_s8 + $0xa8] sm:$0xff]  }
  0x25   : > { %s4274_s24 = sshll.u32 %s5458_s0, 3  ;;  %v806_v17 = vrot.slane %v727_v15, 7  ;;  %v803_v23 = vrot.slane %v727_v15, %v802_v20  ;;  %s708_s2 = scalar_lea.vmem %s6294_s26, %s5458_s0 }
  0x26   : > { %s701_s23 = scalar_lea.vmem %s6289_s29, %s4274_s24  ;;  %s705_s22 = scalar_lea.vmem %s6290_s30, %s4274_s24 }
  0x27   : > { %v710_v6 = vld [vmem:[%s701_s23] sm:$0xff]  ;;  %4671 = vmatpush3.bf16.msra.mxu0 %v5108_v3  ;;  %v808_v18 = vsub.f32 %v727_v15, %v806_v17  ;;  %s6298_s24 = sld [smem:[#allocation21_spill]] }
  0x28   : > { %v728_v7 = vld [vmem:[%s705_s22] sm:$0xff]  ;;  %714 = vperm.xlu0 %5106, %v710_v6   ;;  %4672 = vmatprep.subr.bf16.mxu0 %v5286_v2  ;;  %v5131_v6 = vld [vmem:[%s6243_s8 + $0x90] sm:$0xff]   ;;  %s696_s22 = sand.u32 1, %s5275_s28  }
  0x29   : > { %v729_v8 = vcvt.s32.f32 %v728_v7  ;;  %v817_v22 = vrot.slane %v808_v18, %v816_v19  ;;  %v5128_v3 = vld [vmem:[%s6243_s8 + $0xa0] sm:$0xff]   ;;  %v5132_v7 = vld [vmem:[%s6243_s8 + $0x98] sm:$0xff]   ;;  %s697_s29 = scalar_lea.vmem [#allocation2], %s696_s22  ;;  %s4182_s5 = scalar_lea.sflag [#allocation3], %s696_s22 }
  0x2a   : > { %v730_v21 = vld [vmem:[%s6292_s4] sm:$0xff]  ;;  %s4194_s30 = sshll.u32 %s697_s29, 4  ;;  %s6195_s30 = int_to_ptr.vmem [resolvable:$true] %s4194_s30 }
  0x2b   : > { %4673 = vmatpush3.bf16.msra.mxu0 %v5109_v4  ;;  %v4282_v47 = vld [vmem:[%s6293_s3] ss:$0 sm:$0xff]  ;;  %v5129_v4 = vld [vmem:[%s6243_s8 + $0x78] sm:$0xff]   ;;  %v4288_v18 = vld [vmem:[%s6244_s9 + $0x4] ss:$0 sm:$0xff]  ;;  %s4521_s3 = sshll.u32 %s6295_s25, 4 }
  0x2c   : > { %811 = vperm.xlu0 %5106, %v729_v8   ;;  %4674 = vmatprep.subr.bf16.mxu0 %v5286_v2  ;;  %v5133_v8 = vld [vmem:[%s6243_s8 + $0xb0] sm:$0xff]   ;;  %s5221_s26 = scalar_lea.vmem %s6195_s30, 16  ;;  %s5288_s25 = smov [#allocation2]  }
  0x2d   : > { %s6193_s6 = scalar_lea.hbm %s6298_s24, %s4521_s3  ;;  %p5222_p11 = scmp.ne.s32.totalorder %s6195_s30, %s5221_s26 }
  0x2f   : > { %4675 = vmatpush3.bf16.msra.mxu0 %v758_v9  ;;  %v5134_v9 = vld [vmem:[%s6243_s8 + $0xb8] sm:$0xff]   ;;  %p5223_p12 = pnand %p5222_p11, %p5442_p5 }
  0x30   : > { %4696 = vmatprep.subr.bf16.mxu0 %v5286_v2 }
  0x31   : > { %p5224_p13 = pneg %p5223_p12 }
  0xa7   : > { %v715_v12 = vpop.permute.xlu0 %714 }
  0xa8   : > { %vm716_vm2 = vcmp.eq.s32.totalorder %v715_v12, %v712_v11 }
  0xa9   : > { %v4276_v13 = vsel %vm716_vm2, 1.0, %v5286_v2 }
  0xaa   : > { %v719_v14 = vpack.c.bf16 %v4276_v13, %v4276_v13 }
  0xab   : > { %v812_v24 = vpop.permute.xlu0 %811 }
  0xac   : > { %4677 = vmatmul.mubr.msk.bf16.vlgmr.msra.gmra.mrb[0].mxu0 %vm752_vm3, %v719_v14  ;;  %v818_v29 = vmul.f32 %v817_v22, %v812_v24 }
  0xad   : > { %4700 = vmatprep.mubr.msk.bf16.mxu0 %vm5287_vm1, %v5286_v2  ;;  %4697 = vmatpush3.bf16.msra.mxu0 %v5112_v40 }
  0xae   : > { %4698 = vmatprep.subr.bf16.mxu0 %v5286_v2 }
  0xb1   : > { %4699 = vmatpush3.bf16.msra.mxu0 %v5114_v42 }
  0xb2   : > { %4712 = vmatprep.subr.bf16.mxu0 %v5286_v2 }
 0x17f   : > { %v794_v25 = vpop.f32.mrb[0].mxu0 }
 0x180   : > { %v795_v26 = vadd.f32 %v794_v25, %v730_v21  ;;  %v4678_v27 = vpop.f32.mrb[1].mxu0 }
 0x181   : > { %v797_v28 = vpop.f32.mrb[2].mxu0 }
 0x182   : > { %v804_v30 = vadd.f32 %v803_v23, %v795_v26  ;;  %v4679_v31 = vpop.f32.mrb[3].mxu0 }
 0x183   : > { %v4290_v31 = vld [vmem:[%s6244_s9 + $0x6] ss:$0 sm:$0xff] }
 0x184   : > { %v819_v32 = vadd.f32 %v818_v29, %v804_v30  ;;  %v4284_v29 = vld [vmem:[%s6244_s9] ss:$0 sm:$0xff] }
 0x186   : > { %v823_v33 = vsel %vm822_vm4, %v819_v32, 0.0 }
 0x187   : > { %824 = vadd.xlane.f32.xlu1 %v823_v33 }
 0x214   : > { %v825_v34 = vpop.xlane.xlu1 %824 }
 0x215   : > { %v827_v35 = vmul.f32 0.03125, %v825_v34 }
 0x217   : > { %v828_v36 = vsub.f32 %v819_v32, %v827_v35 }
 0x219   : > { %v829_v37 = vmul.f32 %v828_v36, %v828_v36 }
 0x21b   : > { %v830_v38 = vsel %vm822_vm4, %v829_v37, 0.0 }
 0x21c   : > { %831 = vadd.xlane.f32.xlu1 %v830_v38 }
 0x2a9   : > { %v832_v43 = vpop.xlane.xlu1 %831 }
 0x2aa   : > { %v833_v44 = vmul.f32 0.03125, %v832_v43 }
 0x2ac   : > { %v834_v45 = vadd.f32 1e-12, %v833_v44  ;;  %v4286_v44 = vld [vmem:[%s6244_s9 + $0x2] ss:$0 sm:$0xff] }
 0x2ae   : > { %5173 = vrsqrt.f32 %v834_v45 }
 0x2b8   : > { %v5174_v46 = vpop.eup %5173 }
 0x2b9   : > { %v836_v48 = vmul.f32 %v5174_v46, %v828_v36  ;;  %v4289_v46 = vld [vmem:[%s6244_s9 + $0x5] ss:$0 sm:$0xff] }
 0x2bb   : > { %v843_v50 = vmul.f32 %v4282_v47, %v836_v48  ;;  %v4292_v47 = vld [vmem:[%s6244_s9 + $0x8] ss:$0 sm:$0xff] }
 0x2bd   : > { %v5518_v51 = vadd.f32 %v4283_v49, %v843_v50 }
 0x2bf   : > { %v5528_v54 = vpack.c.bf16 %v5518_v51, %v5518_v51 }
 0x2c1   : > { %4685 = vmatmul.mubr.msk.bf16.vlgmr.msra.gmra.mrb[0].mxu1 %vm822_vm4, %v5528_v54  ;;  %4701 = vmatmul.mubr.msk.bf16.vlgmr.msra.gmra.mrb[4].mxu0 %vm822_vm4, %v5528_v54 }
 0x2c2   : > { %4689 = vmatpush3.bf16.msra.mxu1 %v5115_v52  ;;  %4713 = vmatpush3.bf16.msra.mxu0 %v5116_v53 }
 0x2c3   : > { %4690 = vmatprep.subr.bf16.mxu1 %v5286_v2  ;;  %4714 = vmatprep.subr.bf16.mxu0 %v5286_v2 }
 0x2c4   : > { %4692 = vmatprep.mubr.msk.bf16.mxu1 %vm5287_vm1, %v5286_v2  ;;  %4716 = vmatprep.mubr.msk.bf16.mxu0 %vm5287_vm1, %v5286_v2 }
 0x2c6   : > { %4691 = vmatpush3.bf16.msra.mxu1 %v5117_v55  ;;  %4715 = vmatpush3.bf16.msra.mxu0 %v5118_v56 }
 0x2c7   : > { %4704 = vmatprep.subr.bf16.mxu1 %v5286_v2  ;;  %4728 = vmatprep.subr.bf16.mxu0 %v5286_v2 }
 0x2c9   : > { %4693 = vmatmul.mubr.msk.bf16.vlgmr.msra.gmra.mrb[4].mxu1 %vm822_vm4, %v5528_v54  ;;  %4717 = vmatmul.mubr.msk.bf16.vlgmr.msra.gmra.mrb[8].mxu0 %vm822_vm4, %v5528_v54 }
 0x2ca   : > { %4705 = vmatpush3.bf16.msra.mxu1 %v5119_v57  ;;  %4729 = vmatpush3.bf16.msra.mxu0 %v5120_v58 }
 0x2cb   : > { %4706 = vmatprep.subr.bf16.mxu1 %v5286_v2  ;;  %4730 = vmatprep.subr.bf16.mxu0 %v5286_v2 }
 0x2cc   : > { %4708 = vmatprep.mubr.msk.bf16.mxu1 %vm5287_vm1, %v5286_v2  ;;  %4732 = vmatprep.mubr.msk.bf16.mxu0 %vm5287_vm1, %v5286_v2 }
 0x2ce   : > { %4707 = vmatpush3.bf16.msra.mxu1 %v5121_v59  ;;  %4731 = vmatpush3.bf16.msra.mxu0 %v5122_v60 }
 0x2cf   : > { %4720 = vmatprep.subr.bf16.mxu1 %v5286_v2  ;;  %4744 = vmatprep.subr.bf16.mxu0 %v5286_v2 }
 0x2d1   : > { %4709 = vmatmul.mubr.msk.bf16.vlgmr.msra.gmra.mrb[8].mxu1 %vm822_vm4, %v5528_v54  ;;  %4733 = vmatmul.mubr.msk.bf16.vlgmr.msra.gmra.mrb[12].mxu0 %vm822_vm4, %v5528_v54 }
 0x2d2   : > { %4721 = vmatpush3.bf16.msra.mxu1 %v5123_v61  ;;  %4745 = vmatpush3.bf16.msra.mxu0 %v5124_v62 }
 0x2d3   : > { %4722 = vmatprep.subr.bf16.mxu1 %v5286_v2  ;;  %4746 = vmatprep.subr.bf16.mxu0 %v5286_v2 }
 0x2d4   : > { %4724 = vmatprep.mubr.msk.bf16.mxu1 %vm5287_vm1, %v5286_v2  ;;  %4748 = vmatprep.mubr.msk.bf16.mxu0 %vm5287_vm1, %v5286_v2 }
 0x2d6   : > { %4723 = vmatpush3.bf16.msra.mxu1 %v5125_v63  ;;  %4747 = vmatpush3.bf16.msra.mxu0 %v5126_v0  ;;  %v4285_v63 = vld [vmem:[%s6244_s9 + $0x1] ss:$0 sm:$0xff] }
 0x2d7   : > { %4736 = vmatprep.subr.bf16.mxu1 %v5286_v2  ;;  %4760 = vmatprep.subr.bf16.mxu0 %v5286_v2 }
 0x2d9   : > { %4725 = vmatmul.mubr.msk.bf16.vlgmr.msra.gmra.mrb[12].mxu1 %vm822_vm4, %v5528_v54  ;;  %4749 = vmatmul.mubr.msk.bf16.vlgmr.msra.gmra.mrb[16].mxu0 %vm822_vm4, %v5528_v54 }
 0x2da   : > { %4737 = vmatpush3.bf16.msra.mxu1 %v5127_v1  ;;  %4761 = vmatpush3.bf16.msra.mxu0 %v5128_v3  ;;  %v4291_v3 = vld [vmem:[%s6244_s9 + $0x7] ss:$0 sm:$0xff] }
 0x2db   : > { %4738 = vmatprep.subr.bf16.mxu1 %v5286_v2  ;;  %4762 = vmatprep.subr.bf16.mxu0 %v5286_v2 }
 0x2dc   : > { %4740 = vmatprep.mubr.msk.bf16.mxu1 %vm5287_vm1, %v5286_v2  ;;  %4764 = vmatprep.mubr.msk.bf16.mxu0 %vm5287_vm1, %v5286_v2 }
 0x2de   : > { %4739 = vmatpush3.bf16.msra.mxu1 %v5129_v4  ;;  %4763 = vmatpush3.bf16.msra.mxu0 %v5130_v5 }
 0x2df   : > { %4752 = vmatprep.subr.bf16.mxu1 %v5286_v2  ;;  %4776 = vmatprep.subr.bf16.mxu0 %v5286_v2 }
 0x2e1   : > { %4741 = vmatmul.mubr.msk.bf16.vlgmr.msra.gmra.mrb[16].mxu1 %vm822_vm4, %v5528_v54  ;;  %4765 = vmatmul.mubr.msk.bf16.vlgmr.msra.gmra.mrb[20].mxu0 %vm822_vm4, %v5528_v54 }
 0x2e2   : > { %4753 = vmatpush3.bf16.msra.mxu1 %v5131_v6  ;;  %4756 = vmatprep.mubr.msk.bf16.mxu1 %vm5287_vm1, %v5286_v2 }
 0x2e3   : > { %4754 = vmatprep.subr.bf16.mxu1 %v5286_v2  ;;  %4778 = vmatprep.mubr.msk.bf16.mxu0 %vm5287_vm1, %v5286_v2 }
 0x2e6   : > { %4755 = vmatpush3.bf16.msra.mxu1 %v5132_v7 }
 0x2e7   : > { %4768 = vmatprep.subr.bf16.mxu1 %v5286_v2 }
 0x2e9   : > { %4757 = vmatmul.mubr.msk.bf16.vlgmr.msra.gmra.mrb[20].mxu1 %vm822_vm4, %v5528_v54 }
 0x2ea   : > { %4769 = vmatpush3.bf16.msra.mxu1 %v5133_v8  ;;  %4772 = vmatprep.mubr.msk.bf16.mxu1 %vm5287_vm1, %v5286_v2 }
 0x2eb   : > { %4770 = vmatprep.subr.bf16.mxu1 %v5286_v2 }
 0x2ee   : > { %4771 = vmatpush3.bf16.msra.mxu1 %v5134_v9 }
 0x2ef   : > { %4782 = vmatprep.subr.bf16.mxu1 %v5286_v2 }
 0x2f1   : > { %4773 = vmatmul.mubr.msk.bf16.vlgmr.msra.gmra.mrb[24].mxu1 %vm822_vm4, %v5528_v54 }
 0x2f2   : > { %4784 = vmatprep.mubr.msk.bf16.mxu1 %vm5287_vm1, %v5286_v2 }
 0x394   : > { %v1034_v10 = vpop.f32.mrb[0].mxu1  ;;  %v1138_v11 = vpop.f32.mrb[4].mxu0 }
 0x395   : > { %v4686_v12 = vpop.f32.mrb[1].mxu1  ;;  %v4702_v13 = vpop.f32.mrb[5].mxu0  ;;  %v1035_v32 = vadd.f32 %v4284_v29, %v1034_v10  ;;  %v1139_v48 = vadd.f32 %v4286_v44, %v1138_v11 }
 0x396   : > { %v1037_v14 = vpop.f32.mrb[2].mxu1  ;;  %v1141_v15 = vpop.f32.mrb[6].mxu0 }
 0x397   : > { %v4687_v16 = vpop.f32.mrb[3].mxu1  ;;  %v4703_v17 = vpop.f32.mrb[7].mxu0  ;;  %v1612_v40 = vpack.c.bf16 %v1035_v32, %v1035_v32  ;;  %v1614_v58 = vpack.c.bf16 %v1139_v48, %v1139_v48  ;;  %v5714_v32 = vld [vmem:[%s708_s2] ss:$0 sm:$0xff]  ;;  %s5225_s2 = sshll.u32 %s5288_s25, 4  ;;  %s5226_s2 = int_to_ptr.vmem [resolvable:$false] %s5225_s2 }
 0x398   : > { %v4287_v16 = vld [vmem:[%s6244_s9 + $0x3] ss:$0 sm:$0xff]  ;;  %s5227_s0 = scalar_lea.vmem %s5226_s2, 32  ;;  %p5228_p0 = scmp.lt.s32.totalorder %s6195_s30, %s5226_s2 }
 0x399   : > { %p5229_p1 = scmp.lt.s32.totalorder %s5227_s0, %s5221_s26 }
 0x39b   : > { %p5230_p2 = por %p5229_p1, %p5228_p0 }
 0x39c   : > { %v1086_v19 = vpop.f32.mrb[4].mxu1  ;;  %v1242_v20 = vpop.f32.mrb[8].mxu0 }
 0x39d   : > { %v1243_v21 = vadd.f32 %v4288_v18, %v1242_v20  ;;  %v4694_v22 = vpop.f32.mrb[5].mxu1  ;;  %v4718_v23 = vpop.f32.mrb[9].mxu0  ;;  %v1087_v4 = vadd.f32 %v4285_v63, %v1086_v19  ;;  %v4293_v18 = vld [vmem:[%s6244_s9 + $0x9] ss:$0 sm:$0xff]  ;;  %p5231_p3 = pnand %p5230_p2, %p5224_p13 }
 0x39e   : > { %v1089_v24 = vpop.f32.mrb[6].mxu1  ;;  %v1245_v25 = vpop.f32.mrb[10].mxu0 }
 0x39f   : > { %v1616_v26 = vpack.c.bf16 %v1243_v21, %v1243_v21  ;;  %v4695_v27 = vpop.f32.mrb[7].mxu1  ;;  %v4719_v28 = vpop.f32.mrb[11].mxu0  ;;  %v1613_v12 = vpack.c.bf16 %v1087_v4, %v1087_v4 }
 0x3a1   : > { %v1625_v30 = vsel %vm1620_vm5, %v1616_v26, 0 }
 0x3a2   : > { %4777 = vmatpush3.bf16.xpose.msra.mxu0 %v1625_v30 }
 0x3a3   : > { %4788 = vmatprep.subr.bf16.mxu0 %v5286_v2 }
 0x3a4   : > { %v1190_v33 = vpop.f32.mrb[8].mxu1  ;;  %v1346_v34 = vpop.f32.mrb[12].mxu0 }
 0x3a5   : > { %v1347_v35 = vadd.f32 %v4290_v31, %v1346_v34  ;;  %v4710_v36 = vpop.f32.mrb[9].mxu1  ;;  %v4734_v37 = vpop.f32.mrb[13].mxu0  ;;  %v1191_v19 = vadd.f32 %v4287_v16, %v1190_v33 }
 0x3a6   : > { %v1193_v38 = vpop.f32.mrb[10].mxu1  ;;  %v1349_v39 = vpop.f32.mrb[14].mxu0 }
 0x3a7   : > { %v1618_v41 = vpack.c.bf16 %v1347_v35, %v1347_v35  ;;  %v4711_v42 = vpop.f32.mrb[11].mxu1  ;;  %v4735_v43 = vpop.f32.mrb[15].mxu0  ;;  %v1615_v24 = vpack.c.bf16 %v1191_v19, %v1191_v19 }
 0x3a9   : > { %v1717_v45 = vsel %vm1620_vm5, %v1618_v41, 0  ;;  %4779 = vmatmul.mubr.msk.bf16.vlgmr.msra.gmra.mrb[24].mxu0 %vm1620_vm5, %v1612_v40 }
 0x3aa   : > { %4789 = vmatpush3.bf16.xpose.msra.mxu0 %v1717_v45  ;;  %4790 = vmatprep.mubr.msk.bf16.mxu0 %vm5287_vm1, %v5286_v2 }
 0x3ab   : > { %4800 = vmatprep.subr.bf16.mxu0 %v5286_v2 }
 0x3ac   : > { %v1294_v49 = vpop.f32.mrb[12].mxu1  ;;  %v1450_v50 = vpop.f32.mrb[16].mxu0 }
 0x3ad   : > { %v1295_v52 = vadd.f32 %v4289_v46, %v1294_v49  ;;  %v1451_v53 = vadd.f32 %v4292_v47, %v1450_v50  ;;  %v4726_v54 = vpop.f32.mrb[13].mxu1  ;;  %v4750_v55 = vpop.f32.mrb[17].mxu0 }
 0x3ae   : > { %v1297_v56 = vpop.f32.mrb[14].mxu1  ;;  %v1453_v57 = vpop.f32.mrb[18].mxu0 }
 0x3af   : > { %v1617_v59 = vpack.c.bf16 %v1295_v52, %v1295_v52  ;;  %v1867_v60 = vpack.c.bf16 %v1451_v53, %v1451_v53  ;;  %v4727_v61 = vpop.f32.mrb[15].mxu1  ;;  %v4751_v62 = vpop.f32.mrb[19].mxu0 }
 0x3b1   : > { %v1671_v0 = vsel %vm1620_vm5, %v1617_v59, 0  ;;  %v1876_v1 = vsel %vm1874_vm6, %v1867_v60, 0  ;;  %4791 = vmatmul.mubr.msk.bf16.vlgmr.msra.gmra.mrb[28].mxu0 %vm1620_vm5, %v1614_v58 }
 0x3b2   : > { %4783 = vmatpush3.bf16.xpose.msra.mxu1 %v1671_v0  ;;  %4801 = vmatpush3.bf16.msra.mxu0 %v1876_v1 }
 0x3b3   : > { %4794 = vmatprep.subr.bf16.mxu1 %v5286_v2  ;;  %4802 = vmatprep.mubr.msk.bf16.mxu0 %vm5287_vm1, %v5286_v2 }
 0x3b4   : > { %v1398_v5 = vpop.f32.mrb[16].mxu1  ;;  %v5689_v6 = vpop.f32.mrb[20].mxu0  ;;  %4812 = vmatprep.subr.bf16.mxu0 %v5286_v2 }
 0x3b5   : > { %v1399_v7 = vadd.f32 %v4291_v3, %v1398_v5  ;;  %v4742_v8 = vpop.f32.mrb[17].mxu1  ;;  %v4766_v9 = vpop.f32.mrb[21].mxu0 }
 0x3b6   : > { %v1401_v10 = vpop.f32.mrb[18].mxu1  ;;  %v1557_v11 = vpop.f32.mrb[22].mxu0 }
 0x3b7   : > { %v1619_v13 = vpack.c.bf16 %v1399_v7, %v1399_v7  ;;  %v4743_v14 = vpop.f32.mrb[19].mxu1  ;;  %v4767_v15 = vpop.f32.mrb[23].mxu0 }
 0x3b9   : > { %v1763_v17 = vsel %vm1620_vm5, %v1619_v13, 0  ;;  %4785 = vmatmul.mubr.msk.bf16.vlgmr.msra.gmra.mrb[28].mxu1 %vm1620_vm5, %v1613_v12 }
 0x3ba   : > { %4795 = vmatpush3.bf16.xpose.msra.mxu1 %v1763_v17  ;;  %4796 = vmatprep.mubr.msk.bf16.mxu1 %vm5287_vm1, %v5286_v2 }
 0x3bb   : > { %4806 = vmatprep.subr.bf16.mxu1 %v5286_v2 }
 0x3bc   : > { %v1502_v20 = vpop.f32.mrb[20].mxu1 }
 0x3bd   : > { %v1503_v21 = vadd.f32 %v4293_v18, %v1502_v20  ;;  %v4758_v22 = vpop.f32.mrb[21].mxu1 }
 0x3be   : > { %v1505_v23 = vpop.f32.mrb[22].mxu1 }
 0x3bf   : > { %v1868_v25 = vpack.c.bf16 %v1503_v21, %v1503_v21  ;;  %v4759_v26 = vpop.f32.mrb[23].mxu1  ;;  %v4294_v21 = vld [vmem:[%s6244_s9 + $0xa] ss:$0 sm:$0xff] }
 0x3c0   : > { %v1555_v22 = vadd.f32 %v4294_v21, %v5689_v6  ;;  %v4295_v6 = vld [vmem:[%s6244_s9 + $0xb] ss:$0 sm:$0xff] }
 0x3c1   : > { %v1922_v27 = vsel %vm1874_vm6, %v1868_v25, 0  ;;  %4797 = vmatmul.mubr.msk.bf16.vlgmr.msra.gmra.mrb[32].mxu1 %vm1620_vm5, %v1615_v24 }
 0x3c2   : > { %4807 = vmatpush3.bf16.msra.mxu1 %v1922_v27  ;;  %4808 = vmatprep.mubr.msk.bf16.mxu1 %vm5287_vm1, %v5286_v2  ;;  %v1869_v24 = vpack.c.bf16 %v1555_v22, %v1555_v22 }
 0x3c3   : > { %4818 = vmatprep.subr.bf16.mxu1 %v5286_v2 }
 0x3c4   : > { %v5708_v28 = vpop.f32.mrb[24].mxu1  ;;  %v1968_v27 = vsel %vm1874_vm6, %v1869_v24, 0 }
 0x3c5   : > { %v4774_v29 = vpop.f32.mrb[25].mxu1 }
 0x3c6   : > { %v1609_v30 = vpop.f32.mrb[26].mxu1 }
 0x3c7   : > { %v4775_v31 = vpop.f32.mrb[27].mxu1 }
 0x3c8   : > { %v1607_v31 = vadd.f32 %v4295_v6, %v5708_v28  ;;  %v4345_v6 = vld [vmem:[%s6246_s11] ss:$0 sm:$0xff] }
 0x47c   : > { %v1661_v33 = vpop.f32.mrb[24].mxu0 }
 0x47d   : > { %v1805_v34 = vmul.f32 0.35355338, %v1661_v33  ;;  %v4780_v35 = vpop.f32.mrb[25].mxu0 }
 0x47e   : > { %v1664_v36 = vpop.f32.mrb[26].mxu0  ;;  %v1870_v35 = vpack.c.bf16 %v1607_v31, %v1607_v31 }
 0x47f   : > { %v4781_v37 = vpop.f32.mrb[27].mxu0  ;;  %v1815_v38 = vadd.f32 %v5714_v32, %v1805_v34 }
 0x481   : > { %v1819_v39 = vsel %vm1620_vm5, %v1815_v38, -inf }
 0x482   : > { %1820 = vmax.xlane.f32.xlu0 %v1819_v39  ;;  %v2014_v39 = vsel %vm1874_vm6, %v1870_v35, 0 }
 0x484   : > { %v1753_v40 = vpop.f32.mrb[28].mxu0 }
 0x485   : > { %v4792_v41 = vpop.f32.mrb[29].mxu0  ;;  %v1807_v45 = vmul.f32 0.35355338, %v1753_v40 }
 0x486   : > { %v1756_v42 = vpop.f32.mrb[30].mxu0 }
 0x487   : > { %v4793_v43 = vpop.f32.mrb[31].mxu0  ;;  %v1817_v53 = vadd.f32 %v5714_v32, %v1807_v45 }
 0x489   : > { %v1825_v57 = vsel %vm1620_vm5, %v1817_v53, -inf }
 0x48c   : > { %v1707_v44 = vpop.f32.mrb[28].mxu1 }
 0x48d   : > { %v1806_v46 = vmul.f32 0.35355338, %v1707_v44  ;;  %v4786_v47 = vpop.f32.mrb[29].mxu1  ;;  %v2060_v44 = vld [vmem:[%s6245_s10] sm:$0xf] }
 0x48e   : > { %v1710_v48 = vpop.f32.mrb[30].mxu1  ;;  %v2068_v45 = vsel %vm1874_vm6, %v2060_v44, 0  ;;  %v5136_v44 = vld [vmem:[%s6249_s14 + $0x8] sm:$0xff]  }
 0x48f   : > { %v4787_v49 = vpop.f32.mrb[31].mxu1  ;;  %v1816_v50 = vadd.f32 %v5714_v32, %v1806_v46  ;;  %v2061_v46 = vld [vmem:[%s6245_s10 + $0x4] sm:$0xf]  ;;  %v2062_v48 = vld [vmem:[%s6245_s10 + $0x8] sm:$0xf] }
 0x490   : > { %v2114_v47 = vsel %vm1874_vm6, %v2061_v46, 0 }
 0x491   : > { %v1822_v52 = vsel %vm1620_vm5, %v1816_v50, -inf }
 0x492   : > { %1823 = vmax.xlane.f32.xlu1 %v1822_v52 }
 0x494   : > { %v1799_v54 = vpop.f32.mrb[32].mxu1 }
 0x495   : > { %v1808_v55 = vmul.f32 0.35355338, %v1799_v54  ;;  %v4798_v56 = vpop.f32.mrb[33].mxu1 }
 0x496   : > { %1826 = vmax.xlane.f32.xlu1 %v1825_v57  ;;  %v1802_v58 = vpop.f32.mrb[34].mxu1  ;;  %v2063_v56 = vld [vmem:[%s6245_s10 + $0xc] sm:$0xf] }
 0x497   : > { %v4799_v59 = vpop.f32.mrb[35].mxu1  ;;  %v1818_v60 = vadd.f32 %v5714_v32, %v1808_v55 }
 0x499   : > { %v1828_v61 = vsel %vm1620_vm5, %v1818_v60, -inf }
 0x49a   : > { %1829 = vmax.xlane.f32.xlu1 %v1828_v61 }
 0x50f   : > { %v1821_v62 = vpop.xlane.xlu0 %1820 }
 0x510   : > { %v1831_v63 = vsub.f32 %v1815_v38, %v1821_v62 }
 0x512   : > { %v1835_v0 = vmul.f32 1.442695, %v1831_v63 }
 0x514   : > { %5175 = vpow2.f32 %v1835_v0 }
 0x51e   : > { %v5176_v1 = vpop.eup %5175 }
 0x51f   : > { %v1824_v3 = vpop.xlane.xlu1 %1823  ;;  %v1843_v4 = vsel %vm1620_vm5, %v5176_v1, 0.0 }
 0x520   : > { %v1832_v5 = vsub.f32 %v1816_v50, %v1824_v3  ;;  %1844 = vadd.xlane.f32.xlu1 %v1843_v4 }
 0x522   : > { %v1837_v7 = vmul.f32 1.442695, %v1832_v5 }
 0x523   : > { %v1827_v8 = vpop.xlane.xlu1 %1826 }
 0x524   : > { %5177 = vpow2.f32 %v1837_v7  ;;  %v1833_v9 = vsub.f32 %v1817_v53, %v1827_v8  ;;  %v2160_v53 = vsel %vm1874_vm6, %v2062_v48, 0  ;;  %v4346_v48 = vld [vmem:[%s6247_s12] ss:$0 sm:$0xff] }
 0x526   : > { %v1839_v10 = vmul.f32 1.442695, %v1833_v9 }
 0x527   : > { %v1830_v11 = vpop.xlane.xlu1 %1829 }
 0x528   : > { %5179 = vpow2.f32 %v1839_v10  ;;  %v1834_v12 = vsub.f32 %v1818_v60, %v1830_v11  ;;  %v2206_v60 = vsel %vm1874_vm6, %v2063_v56, 0  ;;  %v5138_v56 = vld [vmem:[%s6251_s16 + $0x8] sm:$0xff]  }
 0x52a   : > { %v1841_v13 = vmul.f32 1.442695, %v1834_v12 }
 0x52c   : > { %5181 = vpow2.f32 %v1841_v13 }
 0x52e   : > { %v5178_v14 = vpop.eup %5177 }
 0x52f   : > { %v1846_v15 = vsel %vm1620_vm5, %v5178_v14, 0.0 }
 0x530   : > { %1847 = vadd.xlane.f32.xlu1 %v1846_v15 }
 0x532   : > { %v5180_v16 = vpop.eup %5179 }
 0x533   : > { %v1849_v17 = vsel %vm1620_vm5, %v5180_v16, 0.0 }
 0x534   : > { %1850 = vadd.xlane.f32.xlu1 %v1849_v17 }
 0x536   : > { %v5182_v18 = vpop.eup %5181 }
 0x537   : > { %v1852_v19 = vsel %vm1620_vm5, %v5182_v18, 0.0 }
 0x538   : > { %1853 = vadd.xlane.f32.xlu1 %v1852_v19 }
 0x5ad   : > { %v1845_v20 = vpop.xlane.xlu1 %1844 }
 0x5ae   : > { %5183 = vrcp.f32 %v1845_v20 }
 0x5b8   : > { %v5184_v23 = vpop.eup %5183 }
 0x5b9   : > { %v1856_v25 = vmul.f32 %v5184_v23, %v5176_v1 }
 0x5bb   : > { %v1863_v26 = vpack.c.bf16 %v1856_v25, %v1856_v25 }
 0x5bd   : > { %4803 = vmatmul.mubr.msk.bf16.vlgmr.msra.gmra.mrb[32].mxu0 %vm1620_vm5, %v1863_v26  ;;  %v1848_v29 = vpop.xlane.xlu1 %1847 }
 0x5be   : > { %4813 = vmatpush3.bf16.msra.mxu0 %v1968_v27  ;;  %5185 = vrcp.f32 %v1848_v29  ;;  %4814 = vmatprep.mubr.msk.bf16.mxu0 %vm5287_vm1, %v5286_v2 }
 0x5bf   : > { %4824 = vmatprep.subr.bf16.mxu0 %v5286_v2 }
 0x5c1   : > { %v1851_v30 = vpop.xlane.xlu1 %1850 }
 0x5c2   : > { %5187 = vrcp.f32 %v1851_v30 }
 0x5c5   : > { %v1854_v33 = vpop.xlane.xlu1 %1853 }
 0x5c6   : > { %5189 = vrcp.f32 %v1854_v33 }
 0x5c8   : > { %v5186_v34 = vpop.eup %5185 }
 0x5c9   : > { %v1858_v36 = vmul.f32 %v5186_v34, %v5178_v14 }
 0x5cb   : > { %v1864_v37 = vpack.c.bf16 %v1858_v36, %v1858_v36 }
 0x5cc   : > { %v5188_v38 = vpop.eup %5187 }
 0x5cd   : > { %v1860_v40 = vmul.f32 %v5188_v38, %v5180_v16  ;;  %4809 = vmatmul.mubr.msk.bf16.vlgmr.msra.gmra.mrb[36].mxu1 %vm1620_vm5, %v1864_v37 }
 0x5ce   : > { %4819 = vmatpush3.bf16.msra.mxu1 %v2014_v39  ;;  %4820 = vmatprep.mubr.msk.bf16.mxu1 %vm5287_vm1, %v5286_v2 }
 0x5cf   : > { %v1865_v41 = vpack.c.bf16 %v1860_v40, %v1860_v40  ;;  %4830 = vmatprep.subr.bf16.mxu1 %v5286_v2 }
 0x5d0   : > { %v5190_v28 = vpop.eup %5189 }
 0x5d1   : > { %v1862_v42 = vmul.f32 %v5190_v28, %v5182_v18  ;;  %4815 = vmatmul.mubr.msk.bf16.vlgmr.msra.gmra.mrb[36].mxu0 %vm1620_vm5, %v1865_v41 }
 0x5d2   : > { %4826 = vmatprep.mubr.msk.bf16.mxu0 %vm5287_vm1, %v5286_v2  ;;  %4825 = vmatpush3.bf16.msra.mxu0 %v2068_v45 }
 0x5d3   : > { %v1866_v43 = vpack.c.bf16 %v1862_v42, %v1862_v42  ;;  %4836 = vmatprep.subr.bf16.mxu0 %v5286_v2 }
 0x5d5   : > { %4821 = vmatmul.mubr.msk.bf16.vlgmr.msra.gmra.mrb[40].mxu1 %vm1620_vm5, %v1866_v43  ;;  %v5135_v43 = vld [vmem:[%s6249_s14] sm:$0xff]  }
 0x5d6   : > { %4832 = vmatprep.mubr.msk.bf16.mxu1 %vm5287_vm1, %v5286_v2  ;;  %4831 = vmatpush3.bf16.msra.mxu1 %v2114_v47 }
 0x5d7   : > { %4842 = vmatprep.subr.bf16.mxu1 %v5286_v2 }
 0x690   : > { %v1912_v49 = vpop.f32.mrb[32].mxu0 }
 0x691   : > { %v2056_v50 = vpack.c.bf16 %v1912_v49, %v1912_v49  ;;  %v4804_v52 = vpop.f32.mrb[33].mxu0 }
 0x692   : > { %v1915_v54 = vpop.f32.mrb[34].mxu0 }
 0x693   : > { %v4805_v55 = vpop.f32.mrb[35].mxu0  ;;  %4827 = vmatmul.mubr.msk.bf16.vlgmr.msra.gmra.mrb[40].mxu0 %vm1620_vm5, %v2056_v50  ;;  %v4347_v50 = vld [vmem:[%s6248_s13] ss:$0 sm:$0xff] }
 0x694   : > { %4837 = vmatpush3.bf16.msra.mxu0 %v2160_v53  ;;  %4838 = vmatprep.mubr.msk.bf16.mxu0 %vm5287_vm1, %v5286_v2  ;;  %v5137_v55 = vld [vmem:[%s6251_s16] sm:$0xff]  }
 0x695   : > { %4848 = vmatprep.subr.bf16.mxu0 %v5286_v2 }
 0x6a0   : > { %v1958_v57 = vpop.f32.mrb[36].mxu1 }
 0x6a1   : > { %v2057_v58 = vpack.c.bf16 %v1958_v57, %v1958_v57  ;;  %v4810_v59 = vpop.f32.mrb[37].mxu1  ;;  %v5139_v57 = vld [vmem:[%s6251_s16 + $0x10] sm:$0xff]  }
 0x6a2   : > { %v1961_v61 = vpop.f32.mrb[38].mxu1  ;;  %v4348_v59 = vld [vmem:[%s6250_s15] ss:$0 sm:$0xff] }
 0x6a3   : > { %v4811_v62 = vpop.f32.mrb[39].mxu1  ;;  %4833 = vmatmul.mubr.msk.bf16.vlgmr.msra.gmra.mrb[44].mxu1 %vm1620_vm5, %v2057_v58  ;;  %v5140_v58 = vld [vmem:[%s6251_s16 + $0x18] sm:$0xff]  }
 0x6a4   : > { %v2004_v63 = vpop.f32.mrb[36].mxu0  ;;  %4843 = vmatpush3.bf16.msra.mxu1 %v2206_v60  ;;  %4844 = vmatprep.mubr.msk.bf16.mxu1 %vm5287_vm1, %v5286_v2 }
 0x6a5   : > { %v2058_v0 = vpack.c.bf16 %v2004_v63, %v2004_v63  ;;  %v4816_v1 = vpop.f32.mrb[37].mxu0  ;;  %4856 = vmatprep.subr.bf16.mxu1 %v5286_v2 }
 0x6a6   : > { %v2007_v3 = vpop.f32.mrb[38].mxu0 }
 0x6a7   : > { %v4817_v4 = vpop.f32.mrb[39].mxu0  ;;  %4839 = vmatmul.mubr.msk.bf16.vlgmr.msra.gmra.mrb[44].mxu0 %vm1620_vm5, %v2058_v0 }
 0x6a8   : > { %v2050_v5 = vpop.f32.mrb[40].mxu1  ;;  %4852 = vmatprep.mubr.msk.bf16.mxu0 %vm5287_vm1, %v5286_v2  ;;  %4849 = vmatpush3.bf16.msra.mxu0 %v5135_v43  ;;  %v5148_v43 = vld [vmem:[%s6243_s8 + $0x108] sm:$0xff]  }
 0x6a9   : > { %v2059_v7 = vpack.c.bf16 %v2050_v5, %v2050_v5  ;;  %v4822_v8 = vpop.f32.mrb[41].mxu1  ;;  %4850 = vmatprep.subr.bf16.mxu0 %v5286_v2 }
 0x6aa   : > { %v2053_v9 = vpop.f32.mrb[42].mxu1 }
 0x6ab   : > { %v4823_v10 = vpop.f32.mrb[43].mxu1  ;;  %4845 = vmatmul.mubr.msk.bf16.vlgmr.msra.gmra.mrb[48].mxu1 %vm1620_vm5, %v2059_v7 }
 0x6ac   : > { %4864 = vmatprep.mubr.msk.bf16.mxu1 %vm5287_vm1, %v5286_v2  ;;  %4851 = vmatpush3.bf16.msra.mxu0 %v5136_v44  ;;  %v5149_v44 = vld [vmem:[%s6243_s8 + $0xf0] sm:$0xff]  }
 0x6ad   : > { %4868 = vmatprep.subr.bf16.mxu0 %v5286_v2  ;;  %4857 = vmatpush3.bf16.msra.mxu1 %v5137_v55  ;;  %v5160_v55 = vld [vmem:[%s6243_s8 + $0x168] sm:$0xff]  }
 0x6ae   : > { %4858 = vmatprep.subr.bf16.mxu1 %v5286_v2 }
 0x6b1   : > { %4859 = vmatpush3.bf16.msra.mxu1 %v5138_v56  ;;  %v5161_v56 = vld [vmem:[%s6243_s8 + $0x150] sm:$0xff]  }
 0x6b2   : > { %4860 = vmatprep.subr.bf16.mxu1 %v5286_v2 }
 0x6b5   : > { %4861 = vmatpush3.bf16.msra.mxu1 %v5139_v57  ;;  %v5162_v57 = vld [vmem:[%s6243_s8 + $0x158] sm:$0xff]  }
 0x6b6   : > { %4862 = vmatprep.subr.bf16.mxu1 %v5286_v2 }
 0x6b9   : > { %4863 = vmatpush3.bf16.msra.mxu1 %v5140_v58  ;;  %v5163_v58 = vld [vmem:[%s6243_s8 + $0x170] sm:$0xff]  }
 0x6ba   : > { %4884 = vmatprep.subr.bf16.mxu1 %v5286_v2 }
 0x766   : > { %v2104_v11 = vpop.f32.mrb[40].mxu0 }
 0x767   : > { %v4828_v12 = vpop.f32.mrb[41].mxu0  ;;  %v2248_v16 = vsel %vm822_vm4, %v2104_v11, 0.0 }
 0x768   : > { %v2107_v13 = vpop.f32.mrb[42].mxu0 }
 0x769   : > { %v4829_v14 = vpop.f32.mrb[43].mxu0  ;;  %v4352_v13 = vld [vmem:[%s6252_s17] ss:$0 sm:$0xff] }
 0x776   : > { %v2150_v15 = vpop.f32.mrb[44].mxu1 }
 0x777   : > { %v2249_v17 = vsel %vm822_vm4, %v2150_v15, 0.0  ;;  %v4834_v18 = vpop.f32.mrb[45].mxu1 }
 0x778   : > { %v2250_v19 = vadd.f32 %v2249_v17, %v2248_v16  ;;  %v2153_v20 = vpop.f32.mrb[46].mxu1 }
 0x779   : > { %v4835_v21 = vpop.f32.mrb[47].mxu1 }
 0x77a   : > { %v2196_v22 = vpop.f32.mrb[44].mxu0 }
 0x77b   : > { %v2251_v23 = vsel %vm822_vm4, %v2196_v22, 0.0  ;;  %v4840_v24 = vpop.f32.mrb[45].mxu0 }
 0x77c   : > { %v2252_v25 = vadd.f32 %v2251_v23, %v2250_v19  ;;  %v2199_v26 = vpop.f32.mrb[46].mxu0 }
 0x77d   : > { %v4841_v27 = vpop.f32.mrb[47].mxu0  ;;  %v5141_v26 = vld [vmem:[%s6243_s8 + $0xc0] sm:$0xff]  }
 0x77e   : > { %v2242_v29 = vpop.f32.mrb[48].mxu1  ;;  %v5142_v27 = vld [vmem:[%s6243_s8 + $0xe0] sm:$0xff]  }
 0x77f   : > { %v2253_v30 = vsel %vm822_vm4, %v2242_v29, 0.0  ;;  %v4846_v31 = vpop.f32.mrb[49].mxu1  ;;  %v5143_v29 = vld [vmem:[%s6243_s8 + $0xc8] sm:$0xff]  }
 0x780   : > { %v2254_v33 = vadd.f32 %v2253_v30, %v2252_v25  ;;  %v2245_v34 = vpop.f32.mrb[50].mxu1  ;;  %v5144_v30 = vld [vmem:[%s6243_s8 + $0xe8] sm:$0xff]  }
 0x781   : > { %v4847_v35 = vpop.f32.mrb[51].mxu1 }
 0x782   : > { %v2262_v36 = vadd.f32 %v4345_v6, %v2254_v33  ;;  %v4358_v35 = vld [vmem:[%s6253_s18] ss:$0 sm:$0xff] }
 0x784   : > { %v2263_v37 = vadd.f32 %v2262_v36, %v5518_v51 }
 0x786   : > { %v2266_v38 = vsel %vm822_vm4, %v2263_v37, 0.0 }
 0x787   : > { %2267 = vadd.xlane.f32.xlu1 %v2266_v38 }
 0x814   : > { %v2268_v39 = vpop.xlane.xlu1 %2267 }
 0x815   : > { %v2269_v40 = vmul.f32 0.03125, %v2268_v39 }
 0x817   : > { %v2270_v41 = vsub.f32 %v2263_v37, %v2269_v40  ;;  %v4359_v37 = vld [vmem:[%s6254_s19] ss:$0 sm:$0xff]  ;;  %v5145_v40 = vld [vmem:[%s6243_s8 + $0xd0] sm:$0xff]  }
 0x819   : > { %v2271_v28 = vmul.f32 %v2270_v41, %v2270_v41 }
 0x81b   : > { %v2272_v42 = vsel %vm822_vm4, %v2271_v28, 0.0 }
 0x81c   : > { %2273 = vadd.xlane.f32.xlu0 %v2272_v42  ;;  %v5147_v42 = vld [vmem:[%s6243_s8 + $0xd8] sm:$0xff]  }
 0x8a9   : > { %v2274_v51 = vpop.xlane.xlu0 %2273 }
 0x8aa   : > { %v2275_v45 = vmul.f32 0.03125, %v2274_v51  ;;  %v5150_v51 = vld [vmem:[%s6243_s8 + $0x120] sm:$0xff]  }
 0x8ac   : > { %v2276_v46 = vadd.f32 1e-12, %v2275_v45  ;;  %v5151_v45 = vld [vmem:[%s6243_s8 + $0xf8] sm:$0xff]  }
 0x8ae   : > { %5191 = vrsqrt.f32 %v2276_v46  ;;  %v5152_v46 = vld [vmem:[%s6243_s8 + $0x128] sm:$0xff]  }
 0x8b8   : > { %v5192_v47 = vpop.eup %5191 }
 0x8b9   : > { %v2278_v49 = vmul.f32 %v5192_v47, %v2270_v41  ;;  %v5146_v41 = vld [vmem:[%s6243_s8 + $0x100] sm:$0xff]   ;;  %v5153_v47 = vld [vmem:[%s6243_s8 + $0x110] sm:$0xff]  }
 0x8bb   : > { %v2285_v52 = vmul.f32 %v4346_v48, %v2278_v49  ;;  %v5154_v48 = vld [vmem:[%s6243_s8 + $0x140] sm:$0xff]   ;;  %v5155_v49 = vld [vmem:[%s6243_s8 + $0x118] sm:$0xff]  }
 0x8bd   : > { %v2292_v53 = vadd.f32 %v4347_v50, %v2285_v52  ;;  %v5156_v50 = vld [vmem:[%s6243_s8 + $0x148] sm:$0xff]   ;;  %v5157_v52 = vld [vmem:[%s6243_s8 + $0x130] sm:$0xff]  }
 0x8bf   : > { %v2293_v54 = vpack.c.bf16 %v2292_v53, %v2292_v53 }
 0x8c1   : > { %4853 = vmatmul.mubr.msk.bf16.vlgmr.msra.gmra.mrb[48].mxu0 %vm822_vm4, %v2293_v54  ;;  %v5159_v54 = vld [vmem:[%s6243_s8 + $0x138] sm:$0xff]  }
 0x8c2   : > { %4872 = vmatprep.mubr.msk.bf16.mxu0 %vm5287_vm1, %v5286_v2  ;;  %4869 = vmatpush3.bf16.msra.mxu0 %v5141_v26 }
 0x8c3   : > { %4870 = vmatprep.subr.bf16.mxu0 %v5286_v2 }
 0x8c6   : > { %4871 = vmatpush3.bf16.msra.mxu0 %v5143_v29 }
 0x8c7   : > { %4876 = vmatprep.subr.bf16.mxu0 %v5286_v2 }
 0x994   : > { %v2354_v60 = vpop.f32.mrb[48].mxu0 }
 0x995   : > { %v2355_v61 = vadd.f32 %v4348_v59, %v2354_v60  ;;  %v4854_v62 = vpop.f32.mrb[49].mxu0  ;;  %v5164_v59 = vld [vmem:[%s6243_s8 + $0x178] sm:$0xff]  }
 0x996   : > { %v2357_v63 = vpop.f32.mrb[50].mxu0 }
 0x997   : > { %v2360_v0 = vmul.f32 %v2355_v61, %v2355_v61  ;;  %v4855_v1 = vpop.f32.mrb[51].mxu0 }
 0x999   : > { %v2361_v3 = vmul.f32 %v2360_v0, %v2355_v61 }
 0x99b   : > { %v2362_v4 = vmul.f32 0.044715, %v2361_v3 }
 0x99d   : > { %v2363_v5 = vadd.f32 %v2362_v4, %v2355_v61 }
 0x99f   : > { %v2364_v7 = vmul.f32 0.7978846, %v2363_v5  ;;  %v4424_v5 = vld [vmem:[%s6244_s9 + $0x10] ss:$0 sm:$0xff] }
 0x9a1   : > { %5193 = vtanh.f32 %v2364_v7 }
 0x9ab   : > { %v5194_v8 = vpop.eup %5193 }
 0x9ac   : > { %v2366_v9 = vadd.f32 1.0, %v5194_v8 }
 0x9ae   : > { %v2367_v10 = vmul.f32 0.5, %v2366_v9 }
 0x9b0   : > { %v2368_v11 = vmul.f32 %v2367_v10, %v2355_v61 }
 0x9b2   : > { %v2369_v12 = vpack.c.bf16 %v2368_v11, %v2368_v11 }
 0x9b4   : > { %4865 = vmatmul.mubr.msk.bf16.vlgmr.msra.gmra.mrb[52].mxu1 %vm2409_vm7, %v2369_v12 }
 0x9b5   : > { %4888 = vmatprep.mubr.msk.bf16.mxu1 %vm5287_vm1, %v5286_v2  ;;  %4885 = vmatpush3.bf16.msra.mxu1 %v5142_v27 }
 0x9b6   : > { %4886 = vmatprep.subr.bf16.mxu1 %v5286_v2 }
 0x9b9   : > { %4887 = vmatpush3.bf16.msra.mxu1 %v5144_v30 }
 0x9ba   : > { %4900 = vmatprep.subr.bf16.mxu1 %v5286_v2 }
 0xa87   : > { %v2447_v14 = vpop.f32.mrb[52].mxu1 }
 0xa88   : > { %v2448_v15 = vadd.f32 %v4352_v13, %v2447_v14  ;;  %v4866_v16 = vpop.f32.mrb[53].mxu1 }
 0xa89   : > { %v2450_v17 = vpop.f32.mrb[54].mxu1 }
 0xa8a   : > { %v4867_v18 = vpop.f32.mrb[55].mxu1  ;;  %v2453_v19 = vadd.f32 %v2448_v15, %v2292_v53  ;;  %v5158_v53 = vld [vmem:[%s6243_s8 + $0x160] sm:$0xff]   ;;  %v4420_v17 = vld [vmem:[%s6244_s9 + $0xc] ss:$0 sm:$0xff] }
 0xa8c   : > { %v2456_v20 = vsel %vm822_vm4, %v2453_v19, 0.0 }
 0xa8d   : > { %2457 = vadd.xlane.f32.xlu1 %v2456_v20 }
 0xb1a   : > { %v2458_v21 = vpop.xlane.xlu1 %2457 }
 0xb1b   : > { %v2459_v22 = vmul.f32 0.03125, %v2458_v21 }
 0xb1d   : > { %v2460_v23 = vsub.f32 %v2453_v19, %v2459_v22  ;;  %v4426_v19 = vld [vmem:[%s6244_s9 + $0x12] ss:$0 sm:$0xff] }
 0xb1f   : > { %v2461_v24 = vmul.f32 %v2460_v23, %v2460_v23 }
 0xb21   : > { %v2462_v25 = vsel %vm822_vm4, %v2461_v24, 0.0 }
 0xb22   : > { %2463 = vadd.xlane.f32.xlu0 %v2462_v25 }
 0xbaf   : > { %v2464_v6 = vpop.xlane.xlu0 %2463 }
 0xbb0   : > { %v2465_v31 = vmul.f32 0.03125, %v2464_v6 }
 0xbb2   : > { %v2466_v33 = vadd.f32 1e-12, %v2465_v31 }
 0xbb4   : > { %5195 = vrsqrt.f32 %v2466_v33  ;;  %v4422_v33 = vld [vmem:[%s6244_s9 + $0xe] ss:$0 sm:$0xff] }
 0xbbe   : > { %v5196_v34 = vpop.eup %5195 }
 0xbbf   : > { %v2468_v36 = vmul.f32 %v5196_v34, %v2460_v23 }
 0xbc1   : > { %v2475_v38 = vmul.f32 %v4358_v35, %v2468_v36  ;;  %v4425_v35 = vld [vmem:[%s6244_s9 + $0x11] ss:$0 sm:$0xff]  ;;  %v4428_v36 = vld [vmem:[%s6244_s9 + $0x14] ss:$0 sm:$0xff] }
 0xbc3   : > { %v5860_v39 = vadd.f32 %v4359_v37, %v2475_v38 }
 0xbc5   : > { %v5870_v28 = vpack.c.bf16 %v5860_v39, %v5860_v39 }
 0xbc7   : > { %4873 = vmatmul.mubr.msk.bf16.vlgmr.msra.gmra.mrb[52].mxu0 %vm822_vm4, %v5870_v28  ;;  %4889 = vmatmul.mubr.msk.bf16.vlgmr.msra.gmra.mrb[56].mxu1 %vm822_vm4, %v5870_v28 }
 0xbc8   : > { %4877 = vmatpush3.bf16.msra.mxu0 %v5145_v40  ;;  %4901 = vmatpush3.bf16.msra.mxu1 %v5146_v41 }
 0xbc9   : > { %4878 = vmatprep.subr.bf16.mxu0 %v5286_v2  ;;  %4902 = vmatprep.subr.bf16.mxu1 %v5286_v2 }
 0xbca   : > { %4880 = vmatprep.mubr.msk.bf16.mxu0 %vm5287_vm1, %v5286_v2  ;;  %4904 = vmatprep.mubr.msk.bf16.mxu1 %vm5287_vm1, %v5286_v2 }
 0xbcc   : > { %4879 = vmatpush3.bf16.msra.mxu0 %v5147_v42  ;;  %4903 = vmatpush3.bf16.msra.mxu1 %v5148_v43 }
 0xbcd   : > { %4892 = vmatprep.subr.bf16.mxu0 %v5286_v2  ;;  %4916 = vmatprep.subr.bf16.mxu1 %v5286_v2 }
 0xbcf   : > { %4881 = vmatmul.mubr.msk.bf16.vlgmr.msra.gmra.mrb[56].mxu0 %vm822_vm4, %v5870_v28  ;;  %4905 = vmatmul.mubr.msk.bf16.vlgmr.msra.gmra.mrb[60].mxu1 %vm822_vm4, %v5870_v28 }
 0xbd0   : > { %4893 = vmatpush3.bf16.msra.mxu0 %v5149_v44  ;;  %4917 = vmatpush3.bf16.msra.mxu1 %v5150_v51 }
 0xbd1   : > { %4894 = vmatprep.subr.bf16.mxu0 %v5286_v2  ;;  %4918 = vmatprep.subr.bf16.mxu1 %v5286_v2 }
 0xbd2   : > { %4896 = vmatprep.mubr.msk.bf16.mxu0 %vm5287_vm1, %v5286_v2  ;;  %4920 = vmatprep.mubr.msk.bf16.mxu1 %vm5287_vm1, %v5286_v2 }
 0xbd4   : > { %4895 = vmatpush3.bf16.msra.mxu0 %v5151_v45  ;;  %4919 = vmatpush3.bf16.msra.mxu1 %v5152_v46 }
 0xbd5   : > { %4908 = vmatprep.subr.bf16.mxu0 %v5286_v2  ;;  %4932 = vmatprep.subr.bf16.mxu1 %v5286_v2 }
 0xbd7   : > { %4897 = vmatmul.mubr.msk.bf16.vlgmr.msra.gmra.mrb[60].mxu0 %vm822_vm4, %v5870_v28  ;;  %4921 = vmatmul.mubr.msk.bf16.vlgmr.msra.gmra.mrb[64].mxu1 %vm822_vm4, %v5870_v28 }
 0xbd8   : > { %4909 = vmatpush3.bf16.msra.mxu0 %v5153_v47  ;;  %4933 = vmatpush3.bf16.msra.mxu1 %v5154_v48 }
 0xbd9   : > { %4910 = vmatprep.subr.bf16.mxu0 %v5286_v2  ;;  %4934 = vmatprep.subr.bf16.mxu1 %v5286_v2 }
 0xbda   : > { %4912 = vmatprep.mubr.msk.bf16.mxu0 %vm5287_vm1, %v5286_v2  ;;  %4936 = vmatprep.mubr.msk.bf16.mxu1 %vm5287_vm1, %v5286_v2 }
 0xbdc   : > { %4911 = vmatpush3.bf16.msra.mxu0 %v5155_v49  ;;  %4935 = vmatpush3.bf16.msra.mxu1 %v5156_v50  ;;  %v4421_v50 = vld [vmem:[%s6244_s9 + $0xd] ss:$0 sm:$0xff] }
 0xbdd   : > { %4924 = vmatprep.subr.bf16.mxu0 %v5286_v2  ;;  %4948 = vmatprep.subr.bf16.mxu1 %v5286_v2 }
 0xbdf   : > { %4913 = vmatmul.mubr.msk.bf16.vlgmr.msra.gmra.mrb[64].mxu0 %vm822_vm4, %v5870_v28  ;;  %4937 = vmatmul.mubr.msk.bf16.vlgmr.msra.gmra.mrb[68].mxu1 %vm822_vm4, %v5870_v28 }
 0xbe0   : > { %4925 = vmatpush3.bf16.msra.mxu0 %v5157_v52  ;;  %4949 = vmatpush3.bf16.msra.mxu1 %v5158_v53 }
 0xbe1   : > { %4926 = vmatprep.subr.bf16.mxu0 %v5286_v2  ;;  %4950 = vmatprep.subr.bf16.mxu1 %v5286_v2 }
 0xbe2   : > { %4928 = vmatprep.mubr.msk.bf16.mxu0 %vm5287_vm1, %v5286_v2  ;;  %4952 = vmatprep.mubr.msk.bf16.mxu1 %vm5287_vm1, %v5286_v2 }
 0xbe4   : > { %4927 = vmatpush3.bf16.msra.mxu0 %v5159_v54  ;;  %4951 = vmatpush3.bf16.msra.mxu1 %v5160_v55  ;;  %v4427_v54 = vld [vmem:[%s6244_s9 + $0x13] ss:$0 sm:$0xff] }
 0xbe5   : > { %4940 = vmatprep.subr.bf16.mxu0 %v5286_v2  ;;  %4964 = vmatprep.subr.bf16.mxu1 %v5286_v2 }
 0xbe7   : > { %4929 = vmatmul.mubr.msk.bf16.vlgmr.msra.gmra.mrb[68].mxu0 %vm822_vm4, %v5870_v28  ;;  %4953 = vmatmul.mubr.msk.bf16.vlgmr.msra.gmra.mrb[72].mxu1 %vm822_vm4, %v5870_v28 }
 0xbe8   : > { %4941 = vmatpush3.bf16.msra.mxu0 %v5161_v56  ;;  %4944 = vmatprep.mubr.msk.bf16.mxu0 %vm5287_vm1, %v5286_v2 }
 0xbe9   : > { %4942 = vmatprep.subr.bf16.mxu0 %v5286_v2  ;;  %4966 = vmatprep.mubr.msk.bf16.mxu1 %vm5287_vm1, %v5286_v2 }
 0xbec   : > { %4943 = vmatpush3.bf16.msra.mxu0 %v5162_v57 }
 0xbed   : > { %4956 = vmatprep.subr.bf16.mxu0 %v5286_v2 }
 0xbef   : > { %4945 = vmatmul.mubr.msk.bf16.vlgmr.msra.gmra.mrb[72].mxu0 %vm822_vm4, %v5870_v28 }
 0xbf0   : > { %4957 = vmatpush3.bf16.msra.mxu0 %v5163_v58  ;;  %4960 = vmatprep.mubr.msk.bf16.mxu0 %vm5287_vm1, %v5286_v2 }
 0xbf1   : > { %4958 = vmatprep.subr.bf16.mxu0 %v5286_v2 }
 0xbf4   : > { %4959 = vmatpush3.bf16.msra.mxu0 %v5164_v59 }
 0xbf5   : > { %4970 = vmatprep.subr.bf16.mxu0 %v5286_v2 }
 0xbf7   : > { %4961 = vmatmul.mubr.msk.bf16.vlgmr.msra.gmra.mrb[76].mxu0 %vm822_vm4, %v5870_v28 }
 0xbf8   : > { %4972 = vmatprep.mubr.msk.bf16.mxu0 %vm5287_vm1, %v5286_v2 }
 0xc9a   : > { %v2667_v60 = vpop.f32.mrb[52].mxu0  ;;  %v2771_v61 = vpop.f32.mrb[56].mxu1 }
 0xc9b   : > { %v4874_v62 = vpop.f32.mrb[53].mxu0  ;;  %v4890_v63 = vpop.f32.mrb[57].mxu1  ;;  %v2668_v20 = vadd.f32 %v4420_v17, %v2667_v60  ;;  %v2772_v37 = vadd.f32 %v4422_v33, %v2771_v61 }
 0xc9c   : > { %v2670_v0 = vpop.f32.mrb[54].mxu0  ;;  %v2774_v1 = vpop.f32.mrb[58].mxu1 }
 0xc9d   : > { %v4875_v3 = vpop.f32.mrb[55].mxu0  ;;  %v4891_v4 = vpop.f32.mrb[59].mxu1  ;;  %v3245_v29 = vpack.c.bf16 %v2668_v20, %v2668_v20  ;;  %v3247_v45 = vpack.c.bf16 %v2772_v37, %v2772_v37 }
 0xc9e   : > { %v4423_v4 = vld [vmem:[%s6244_s9 + $0xf] ss:$0 sm:$0xff] }
 0xca2   : > { %v2719_v7 = vpop.f32.mrb[56].mxu0  ;;  %v2875_v8 = vpop.f32.mrb[60].mxu1 }
 0xca3   : > { %v2876_v9 = vadd.f32 %v4424_v5, %v2875_v8  ;;  %v4882_v10 = vpop.f32.mrb[57].mxu0  ;;  %v4906_v11 = vpop.f32.mrb[61].mxu1  ;;  %v2720_v55 = vadd.f32 %v4421_v50, %v2719_v7  ;;  %v4429_v7 = vld [vmem:[%s6244_s9 + $0x15] ss:$0 sm:$0xff] }
 0xca4   : > { %v2722_v12 = vpop.f32.mrb[58].mxu0  ;;  %v2878_v13 = vpop.f32.mrb[62].mxu1 }
 0xca5   : > { %v3249_v14 = vpack.c.bf16 %v2876_v9, %v2876_v9  ;;  %v4883_v15 = vpop.f32.mrb[59].mxu0  ;;  %v4907_v16 = vpop.f32.mrb[63].mxu1  ;;  %v3246_v63 = vpack.c.bf16 %v2720_v55, %v2720_v55 }
 0xca7   : > { %v3257_v18 = vsel %vm1620_vm5, %v3249_v14, 0 }
 0xca8   : > { %4965 = vmatpush3.bf16.xpose.msra.mxu1 %v3257_v18 }
 0xca9   : > { %4976 = vmatprep.subr.bf16.mxu1 %v5286_v2 }
 0xcaa   : > { %v2823_v21 = vpop.f32.mrb[60].mxu0  ;;  %v2979_v22 = vpop.f32.mrb[64].mxu1 }
 0xcab   : > { %v2980_v23 = vadd.f32 %v4426_v19, %v2979_v22  ;;  %v4898_v24 = vpop.f32.mrb[61].mxu0  ;;  %v4922_v25 = vpop.f32.mrb[65].mxu1  ;;  %v2824_v8 = vadd.f32 %v4423_v4, %v2823_v21 }
 0xcac   : > { %v2826_v26 = vpop.f32.mrb[62].mxu0  ;;  %v2982_v27 = vpop.f32.mrb[66].mxu1 }
 0xcad   : > { %v3251_v30 = vpack.c.bf16 %v2980_v23, %v2980_v23  ;;  %v4899_v6 = vpop.f32.mrb[63].mxu0  ;;  %v4923_v31 = vpop.f32.mrb[67].mxu1  ;;  %v3248_v13 = vpack.c.bf16 %v2824_v8, %v2824_v8 }
 0xcaf   : > { %v3349_v34 = vsel %vm1620_vm5, %v3251_v30, 0  ;;  %4967 = vmatmul.mubr.msk.bf16.vlgmr.msra.gmra.mrb[76].mxu1 %vm1620_vm5, %v3245_v29 }
 0xcb0   : > { %4977 = vmatpush3.bf16.xpose.msra.mxu1 %v3349_v34  ;;  %4978 = vmatprep.mubr.msk.bf16.mxu1 %vm5287_vm1, %v5286_v2 }
 0xcb1   : > { %4988 = vmatprep.subr.bf16.mxu1 %v5286_v2 }
 0xcb2   : > { %v2927_v38 = vpop.f32.mrb[64].mxu0  ;;  %v3083_v40 = vpop.f32.mrb[68].mxu1 }
 0xcb3   : > { %v2928_v41 = vadd.f32 %v4425_v35, %v2927_v38  ;;  %v3084_v28 = vadd.f32 %v4428_v36, %v3083_v40  ;;  %v4914_v42 = vpop.f32.mrb[65].mxu0  ;;  %v4938_v43 = vpop.f32.mrb[69].mxu1 }
 0xcb4   : > { %v2930_v44 = vpop.f32.mrb[66].mxu0  ;;  %v3086_v51 = vpop.f32.mrb[70].mxu1 }
 0xcb5   : > { %v3250_v46 = vpack.c.bf16 %v2928_v41, %v2928_v41  ;;  %v3493_v47 = vpack.c.bf16 %v3084_v28, %v3084_v28  ;;  %v4915_v48 = vpop.f32.mrb[67].mxu0  ;;  %v4939_v49 = vpop.f32.mrb[71].mxu1 }
 0xcb7   : > { %v3303_v52 = vsel %vm1620_vm5, %v3250_v46, 0  ;;  %v3501_v53 = vsel %vm1874_vm6, %v3493_v47, 0  ;;  %4979 = vmatmul.mubr.msk.bf16.vlgmr.msra.gmra.mrb[80].mxu1 %vm1620_vm5, %v3247_v45 }
 0xcb8   : > { %4971 = vmatpush3.bf16.xpose.msra.mxu0 %v3303_v52  ;;  %4989 = vmatpush3.bf16.msra.mxu1 %v3501_v53 }
 0xcb9   : > { %4982 = vmatprep.subr.bf16.mxu0 %v5286_v2  ;;  %4990 = vmatprep.mubr.msk.bf16.mxu1 %vm5287_vm1, %v5286_v2 }
 0xcba   : > { %v3031_v56 = vpop.f32.mrb[68].mxu0  ;;  %v6031_v57 = vpop.f32.mrb[72].mxu1  ;;  %5000 = vmatprep.subr.bf16.mxu1 %v5286_v2 }
 0xcbb   : > { %v3032_v58 = vadd.f32 %v4427_v54, %v3031_v56  ;;  %v4930_v59 = vpop.f32.mrb[69].mxu0  ;;  %v4954_v60 = vpop.f32.mrb[73].mxu1 }
 0xcbc   : > { %v3034_v61 = vpop.f32.mrb[70].mxu0  ;;  %v3190_v62 = vpop.f32.mrb[74].mxu1 }
 0xcbd   : > { %v3252_v0 = vpack.c.bf16 %v3032_v58, %v3032_v58  ;;  %v4931_v1 = vpop.f32.mrb[71].mxu0  ;;  %v4955_v3 = vpop.f32.mrb[75].mxu1 }
 0xcbf   : > { %v3395_v5 = vsel %vm1620_vm5, %v3252_v0, 0  ;;  %4973 = vmatmul.mubr.msk.bf16.vlgmr.msra.gmra.mrb[80].mxu0 %vm1620_vm5, %v3246_v63 }
 0xcc0   : > { %4983 = vmatpush3.bf16.xpose.msra.mxu0 %v3395_v5  ;;  %4984 = vmatprep.mubr.msk.bf16.mxu0 %vm5287_vm1, %v5286_v2 }
 0xcc1   : > { %4994 = vmatprep.subr.bf16.mxu0 %v5286_v2 }
 0xcc2   : > { %v3135_v9 = vpop.f32.mrb[72].mxu0 }
 0xcc3   : > { %v3136_v10 = vadd.f32 %v4429_v7, %v3135_v9  ;;  %v4946_v11 = vpop.f32.mrb[73].mxu0  ;;  %v4430_v9 = vld [vmem:[%s6244_s9 + $0x16] ss:$0 sm:$0xff] }
 0xcc4   : > { %v3138_v12 = vpop.f32.mrb[74].mxu0 }
 0xcc5   : > { %v3494_v14 = vpack.c.bf16 %v3136_v10, %v3136_v10  ;;  %v4947_v15 = vpop.f32.mrb[75].mxu0  ;;  %v3188_v10 = vadd.f32 %v4430_v9, %v6031_v57 }
 0xcc7   : > { %v3547_v16 = vsel %vm1874_vm6, %v3494_v14, 0  ;;  %4985 = vmatmul.mubr.msk.bf16.vlgmr.msra.gmra.mrb[84].mxu0 %vm1620_vm5, %v3248_v13  ;;  %v3495_v13 = vpack.c.bf16 %v3188_v10, %v3188_v10 }
 0xcc8   : > { %4995 = vmatpush3.bf16.msra.mxu0 %v3547_v16  ;;  %4996 = vmatprep.mubr.msk.bf16.mxu0 %vm5287_vm1, %v5286_v2 }
 0xcc9   : > { %5006 = vmatprep.subr.bf16.mxu0 %v5286_v2  ;;  %v3593_v16 = vsel %vm1874_vm6, %v3495_v13, 0 }
 0xcca   : > { %v6050_v17 = vpop.f32.mrb[76].mxu0 }
 0xccb   : > { %v4962_v18 = vpop.f32.mrb[77].mxu0 }
 0xccc   : > { %v3242_v19 = vpop.f32.mrb[78].mxu0 }
 0xccd   : > { %v4963_v20 = vpop.f32.mrb[79].mxu0 }
 0xcce   : > { %v4431_v20 = vld [vmem:[%s6244_s9 + $0x17] ss:$0 sm:$0xff] }
 0xd82   : > { %v3293_v21 = vpop.f32.mrb[76].mxu1 }
 0xd83   : > { %v3437_v22 = vmul.f32 0.35355338, %v3293_v21  ;;  %v4968_v23 = vpop.f32.mrb[77].mxu1 }
 0xd84   : > { %v3296_v24 = vpop.f32.mrb[78].mxu1 }
 0xd85   : > { %v4969_v25 = vpop.f32.mrb[79].mxu1  ;;  %v3441_v26 = vadd.f32 %v5714_v32, %v3437_v22  ;;  %v3240_v22 = vadd.f32 %v4431_v20, %v6050_v17 }
 0xd87   : > { %v3445_v27 = vsel %vm1620_vm5, %v3441_v26, -inf  ;;  %v3496_v25 = vpack.c.bf16 %v3240_v22, %v3240_v22 }
 0xd88   : > { %3446 = vmax.xlane.f32.xlu1 %v3445_v27 }
 0xd8a   : > { %v3385_v29 = vpop.f32.mrb[80].mxu1 }
 0xd8b   : > { %v3439_v30 = vmul.f32 0.35355338, %v3385_v29  ;;  %v4980_v6 = vpop.f32.mrb[81].mxu1  ;;  %v3639_v29 = vsel %vm1874_vm6, %v3496_v25, 0 }
 0xd8c   : > { %v3388_v31 = vpop.f32.mrb[82].mxu1 }
 0xd8d   : > { %v4981_v33 = vpop.f32.mrb[83].mxu1  ;;  %v3443_v34 = vadd.f32 %v5714_v32, %v3439_v30  ;;  %v4476_v31 = vld [vmem:[%s6245_s10 + $0x10] sm:$0xf] }
 0xd8e   : > { %v3694_v33 = vsel %vm1874_vm6, %v4476_v31, 0 }
 0xd8f   : > { %v3451_v35 = vsel %vm1620_vm5, %v3443_v34, -inf }
 0xd90   : > { %3452 = vmax.xlane.f32.xlu1 %v3451_v35 }
 0xd92   : > { %v3339_v36 = vpop.f32.mrb[80].mxu0 }
 0xd93   : > { %v3438_v37 = vmul.f32 0.35355338, %v3339_v36  ;;  %v4974_v38 = vpop.f32.mrb[81].mxu0  ;;  %v4478_v36 = vld [vmem:[%s6245_s10 + $0x18] sm:$0xf] }
 0xd94   : > { %v3342_v40 = vpop.f32.mrb[82].mxu0 }
 0xd95   : > { %v4975_v41 = vpop.f32.mrb[83].mxu0  ;;  %v3442_v28 = vadd.f32 %v5714_v32, %v3438_v37 }
 0xd96   : > { %v3786_v41 = vsel %vm1874_vm6, %v4478_v36, 0 }
 0xd97   : > { %v3448_v42 = vsel %vm1620_vm5, %v3442_v28, -inf }
 0xd98   : > { %3449 = vmax.xlane.f32.xlu0 %v3448_v42 }
 0xd9a   : > { %v3431_v43 = vpop.f32.mrb[84].mxu0 }
 0xd9b   : > { %v3440_v44 = vmul.f32 0.35355338, %v3431_v43  ;;  %v4986_v51 = vpop.f32.mrb[85].mxu0 }
 0xd9c   : > { %v3434_v45 = vpop.f32.mrb[86].mxu0 }
 0xd9d   : > { %v4987_v46 = vpop.f32.mrb[87].mxu0  ;;  %v3444_v47 = vadd.f32 %v5714_v32, %v3440_v44 }
 0xd9f   : > { %v3454_v48 = vsel %vm1620_vm5, %v3444_v47, -inf }
 0xda0   : > { %3455 = vmax.xlane.f32.xlu0 %v3454_v48 }
 0xe15   : > { %v3447_v49 = vpop.xlane.xlu1 %3446 }
 0xe16   : > { %v3457_v50 = vsub.f32 %v3441_v26, %v3447_v49 }
 0xe18   : > { %v3461_v52 = vmul.f32 1.442695, %v3457_v50 }
 0xe1a   : > { %5197 = vpow2.f32 %v3461_v52 }
 0xe1d   : > { %v3453_v53 = vpop.xlane.xlu1 %3452 }
 0xe1e   : > { %v3459_v54 = vsub.f32 %v3443_v34, %v3453_v53  ;;  %v4477_v34 = vld [vmem:[%s6245_s10 + $0x14] sm:$0xf] }
 0xe1f   : > { %v3740_v35 = vsel %vm1874_vm6, %v4477_v34, 0 }
 0xe20   : > { %v3465_v55 = vmul.f32 1.442695, %v3459_v54 }
 0xe22   : > { %5199 = vpow2.f32 %v3465_v55 }
 0xe24   : > { %v5198_v56 = vpop.eup %5197 }
 0xe25   : > { %v3450_v58 = vpop.xlane.xlu0 %3449  ;;  %v3469_v59 = vsel %vm1620_vm5, %v5198_v56, 0.0 }
 0xe26   : > { %v3458_v60 = vsub.f32 %v3442_v28, %v3450_v58  ;;  %3470 = vadd.xlane.f32.xlu1 %v3469_v59 }
 0xe28   : > { %v3463_v61 = vmul.f32 1.442695, %v3458_v60 }
 0xe2a   : > { %5201 = vpow2.f32 %v3463_v61 }
 0xe2c   : > { %v5200_v32 = vpop.eup %5199 }
 0xe2d   : > { %v3456_v62 = vpop.xlane.xlu0 %3455  ;;  %v3475_v63 = vsel %vm1620_vm5, %v5200_v32, 0.0 }
 0xe2e   : > { %v3460_v0 = vsub.f32 %v3444_v47, %v3456_v62  ;;  %3476 = vadd.xlane.f32.xlu1 %v3475_v63  ;;  %v4479_v47 = vld [vmem:[%s6245_s10 + $0x1c] sm:$0xf] }
 0xe2f   : > { %v3832_v52 = vsel %vm1874_vm6, %v4479_v47, 0 }
 0xe30   : > { %v3467_v1 = vmul.f32 1.442695, %v3460_v0 }
 0xe32   : > { %5203 = vpow2.f32 %v3467_v1 }
 0xe34   : > { %v5202_v3 = vpop.eup %5201 }
 0xe35   : > { %v3472_v4 = vsel %vm1620_vm5, %v5202_v3, 0.0 }
 0xe36   : > { %3473 = vadd.xlane.f32.xlu0 %v3472_v4 }
 0xe3c   : > { %v5204_v5 = vpop.eup %5203 }
 0xe3d   : > { %v3478_v7 = vsel %vm1620_vm5, %v5204_v5, 0.0 }
 0xe3e   : > { %3479 = vadd.xlane.f32.xlu0 %v3478_v7 }
 0xeb3   : > { %v3471_v8 = vpop.xlane.xlu1 %3470 }
 0xeb4   : > { %5205 = vrcp.f32 %v3471_v8 }
 0xebb   : > { %v3477_v11 = vpop.xlane.xlu1 %3476 }
 0xebc   : > { %5207 = vrcp.f32 %v3477_v11 }
 0xebe   : > { %v5206_v12 = vpop.eup %5205 }
 0xebf   : > { %v3482_v14 = vmul.f32 %v5206_v12, %v5198_v56 }
 0xec1   : > { %v3489_v15 = vpack.c.bf16 %v3482_v14, %v3482_v14 }
 0xec3   : > { %v3474_v18 = vpop.xlane.xlu0 %3473  ;;  %4991 = vmatmul.mubr.msk.bf16.vlgmr.msra.gmra.mrb[84].mxu1 %vm1620_vm5, %v3489_v15 }
 0xec4   : > { %5209 = vrcp.f32 %v3474_v18  ;;  %5001 = vmatpush3.bf16.msra.mxu1 %v3593_v16  ;;  %5002 = vmatprep.mubr.msk.bf16.mxu1 %vm5287_vm1, %v5286_v2  ;;  %v4485_v18 = vld [vmem:[%s6246_s11 + $0x1] ss:$0 sm:$0xff] }
 0xec5   : > { %5012 = vmatprep.subr.bf16.mxu1 %v5286_v2 }
 0xec6   : > { %v5208_v19 = vpop.eup %5207 }
 0xec7   : > { %v3486_v57 = vmul.f32 %v5208_v19, %v5200_v32 }
 0xec9   : > { %v3491_v21 = vpack.c.bf16 %v3486_v57, %v3486_v57 }
 0xecb   : > { %v3480_v23 = vpop.xlane.xlu0 %3479  ;;  %5003 = vmatmul.mubr.msk.bf16.vlgmr.msra.gmra.mrb[88].mxu1 %vm1620_vm5, %v3491_v21 }
 0xecc   : > { %5211 = vrcp.f32 %v3480_v23  ;;  %5014 = vmatprep.mubr.msk.bf16.mxu1 %vm5287_vm1, %v5286_v2  ;;  %5013 = vmatpush3.bf16.msra.mxu1 %v3694_v33 }
 0xecd   : > { %5024 = vmatprep.subr.bf16.mxu1 %v5286_v2 }
 0xece   : > { %v5210_v24 = vpop.eup %5209 }
 0xecf   : > { %v3484_v26 = vmul.f32 %v5210_v24, %v5202_v3 }
 0xed1   : > { %v3490_v27 = vpack.c.bf16 %v3484_v26, %v3484_v26 }
 0xed3   : > { %4997 = vmatmul.mubr.msk.bf16.vlgmr.msra.gmra.mrb[88].mxu0 %vm1620_vm5, %v3490_v27 }
 0xed4   : > { %5007 = vmatpush3.bf16.msra.mxu0 %v3639_v29  ;;  %5008 = vmatprep.mubr.msk.bf16.mxu0 %vm5287_vm1, %v5286_v2 }
 0xed5   : > { %5018 = vmatprep.subr.bf16.mxu0 %v5286_v2 }
 0xed6   : > { %v5212_v17 = vpop.eup %5211 }
 0xed7   : > { %v3488_v30 = vmul.f32 %v5212_v17, %v5204_v5 }
 0xed9   : > { %v3492_v6 = vpack.c.bf16 %v3488_v30, %v3488_v30  ;;  %v5165_v30 = vld [vmem:[%s6249_s14 + $0x10] sm:$0xff]  }
 0xedb   : > { %5009 = vmatmul.mubr.msk.bf16.vlgmr.msra.gmra.mrb[92].mxu0 %vm1620_vm5, %v3492_v6  ;;  %v5166_v6 = vld [vmem:[%s6249_s14 + $0x18] sm:$0xff]  }
 0xedc   : > { %5020 = vmatprep.mubr.msk.bf16.mxu0 %vm5287_vm1, %v5286_v2  ;;  %5019 = vmatpush3.bf16.msra.mxu0 %v3740_v35  ;;  %v4488_v35 = vld [vmem:[%s6247_s12 + $0x1] ss:$0 sm:$0xff] }
 0xedd   : > { %5030 = vmatprep.subr.bf16.mxu0 %v5286_v2 }
 0xf96   : > { %v3537_v37 = vpop.f32.mrb[84].mxu1 }
 0xf97   : > { %v3681_v38 = vpack.c.bf16 %v3537_v37, %v3537_v37  ;;  %v4992_v40 = vpop.f32.mrb[85].mxu1  ;;  %v4489_v37 = vld [vmem:[%s6248_s13 + $0x1] ss:$0 sm:$0xff] }
 0xf98   : > { %v3540_v28 = vpop.f32.mrb[86].mxu1 }
 0xf99   : > { %v4993_v42 = vpop.f32.mrb[87].mxu1  ;;  %5015 = vmatmul.mubr.msk.bf16.vlgmr.msra.gmra.mrb[92].mxu1 %vm1620_vm5, %v3681_v38  ;;  %v5167_v28 = vld [vmem:[%s6251_s16 + $0x20] sm:$0xff]  }
 0xf9a   : > { %5025 = vmatpush3.bf16.msra.mxu1 %v3786_v41  ;;  %5026 = vmatprep.mubr.msk.bf16.mxu1 %vm5287_vm1, %v5286_v2  ;;  %v5168_v42 = vld [vmem:[%s6251_s16 + $0x28] sm:$0xff]  }
 0xf9b   : > { %5036 = vmatprep.subr.bf16.mxu1 %v5286_v2 }
 0xf9e   : > { %v3629_v43 = vpop.f32.mrb[88].mxu1 }
 0xf9f   : > { %v3683_v44 = vpack.c.bf16 %v3629_v43, %v3629_v43  ;;  %v5004_v51 = vpop.f32.mrb[89].mxu1  ;;  %v5169_v43 = vld [vmem:[%s6251_s16 + $0x30] sm:$0xff]  }
 0xfa0   : > { %v3632_v45 = vpop.f32.mrb[90].mxu1  ;;  %v4495_v51 = vld [vmem:[%s6250_s15 + $0x1] ss:$0 sm:$0xff] }
 0xfa1   : > { %v5005_v46 = vpop.f32.mrb[91].mxu1  ;;  %5027 = vmatmul.mubr.msk.bf16.vlgmr.msra.gmra.mrb[96].mxu1 %vm1620_vm5, %v3683_v44  ;;  %v5170_v44 = vld [vmem:[%s6251_s16 + $0x38] sm:$0xff]  }
 0xfa2   : > { %5040 = vmatprep.mubr.msk.bf16.mxu1 %vm5287_vm1, %v5286_v2  ;;  %5037 = vmatpush3.bf16.msra.mxu1 %v5165_v30 }
 0xfa3   : > { %5038 = vmatprep.subr.bf16.mxu1 %v5286_v2 }
 0xfa6   : > { %v3583_v48 = vpop.f32.mrb[88].mxu0  ;;  %5039 = vmatpush3.bf16.msra.mxu1 %v5166_v6 }
 0xfa7   : > { %v3682_v49 = vpack.c.bf16 %v3583_v48, %v3583_v48  ;;  %v4998_v50 = vpop.f32.mrb[89].mxu0  ;;  %5056 = vmatprep.subr.bf16.mxu1 %v5286_v2 }
 0xfa8   : > { %v3586_v53 = vpop.f32.mrb[90].mxu0 }
 0xfa9   : > { %v4999_v54 = vpop.f32.mrb[91].mxu0  ;;  %5021 = vmatmul.mubr.msk.bf16.vlgmr.msra.gmra.mrb[96].mxu0 %vm1620_vm5, %v3682_v49 }
 0xfaa   : > { %5031 = vmatpush3.bf16.msra.mxu0 %v3832_v52  ;;  %5032 = vmatprep.mubr.msk.bf16.mxu0 %vm5287_vm1, %v5286_v2 }
 0xfab   : > { %5044 = vmatprep.subr.bf16.mxu0 %v5286_v2 }
 0xfae   : > { %v3675_v55 = vpop.f32.mrb[92].mxu0 }
 0xfaf   : > { %v3684_v56 = vpack.c.bf16 %v3675_v55, %v3675_v55  ;;  %v5010_v58 = vpop.f32.mrb[93].mxu0 }
 0xfb0   : > { %v3678_v59 = vpop.f32.mrb[94].mxu0 }
 0xfb1   : > { %v5011_v60 = vpop.f32.mrb[95].mxu0  ;;  %5033 = vmatmul.mubr.msk.bf16.vlgmr.msra.gmra.mrb[100].mxu0 %vm1620_vm5, %v3684_v56 }
 0xfb2   : > { %5052 = vmatprep.mubr.msk.bf16.mxu0 %vm5287_vm1, %v5286_v2  ;;  %5045 = vmatpush3.bf16.msra.mxu0 %v5167_v28 }
 0xfb3   : > { %5046 = vmatprep.subr.bf16.mxu0 %v5286_v2 }
 0xfb6   : > { %5047 = vmatpush3.bf16.msra.mxu0 %v5168_v42 }
 0xfb7   : > { %5048 = vmatprep.subr.bf16.mxu0 %v5286_v2 }
 0xfba   : > { %5049 = vmatpush3.bf16.msra.mxu0 %v5169_v43 }
 0xfbb   : > { %5050 = vmatprep.subr.bf16.mxu0 %v5286_v2 }
 0xfbe   : > { %5051 = vmatpush3.bf16.msra.mxu0 %v5170_v44 }
0x106c   : > { %v3730_v61 = vpop.f32.mrb[92].mxu1 }
0x106d   : > { %v5016_v32 = vpop.f32.mrb[93].mxu1  ;;  %v3874_v7 = vsel %vm822_vm4, %v3730_v61, 0.0 }
0x106e   : > { %v3733_v62 = vpop.f32.mrb[94].mxu1  ;;  %v4508_v32 = vld [vmem:[%s6252_s17 + $0x1] ss:$0 sm:$0xff] }
0x106f   : > { %v5017_v63 = vpop.f32.mrb[95].mxu1 }
0x1074   : > { %v3822_v0 = vpop.f32.mrb[96].mxu1 }
0x1075   : > { %v5028_v1 = vpop.f32.mrb[97].mxu1  ;;  %v3877_v12 = vsel %vm822_vm4, %v3822_v0, 0.0 }
0x1076   : > { %v3825_v3 = vpop.f32.mrb[98].mxu1 }
0x1077   : > { %v5029_v4 = vpop.f32.mrb[99].mxu1 }
0x107c   : > { %v3776_v5 = vpop.f32.mrb[96].mxu0 }
0x107d   : > { %v3875_v8 = vsel %vm822_vm4, %v3776_v5, 0.0  ;;  %v5022_v9 = vpop.f32.mrb[97].mxu0 }
0x107e   : > { %v3876_v10 = vadd.f32 %v3875_v8, %v3874_v7  ;;  %v3779_v11 = vpop.f32.mrb[98].mxu0 }
0x107f   : > { %v5023_v13 = vpop.f32.mrb[99].mxu0 }
0x1080   : > { %v3878_v14 = vadd.f32 %v3877_v12, %v3876_v10  ;;  %v5171_v12 = vld [vmem:[%s6255_s20] sm:$0xff]   ;;  %v5172_v13 = vld [vmem:[%s6255_s20 + $0x8] sm:$0xff]  }
0x1084   : > { %v3868_v15 = vpop.f32.mrb[100].mxu0 }
0x1085   : > { %v3879_v16 = vsel %vm822_vm4, %v3868_v15, 0.0  ;;  %v5034_v19 = vpop.f32.mrb[101].mxu0 }
0x1086   : > { %v3880_v57 = vadd.f32 %v3879_v16, %v3878_v14  ;;  %v3871_v20 = vpop.f32.mrb[102].mxu0  ;;  %v4516_v19 = vld [vmem:[%s6253_s18 + $0x1] ss:$0 sm:$0xff] }
0x1087   : > { %v5035_v21 = vpop.f32.mrb[103].mxu0  ;;  %v4517_v20 = vld [vmem:[%s6254_s19 + $0x1] ss:$0 sm:$0xff] }
0x1088   : > { %v3889_v22 = vadd.f32 %v4485_v18, %v3880_v57 }
0x108a   : > { %v3890_v23 = vadd.f32 %v3889_v22, %v5860_v39 }
0x108c   : > { %v3895_v24 = vsel %vm822_vm4, %v3890_v23, 0.0 }
0x108d   : > { %3896 = vadd.xlane.f32.xlu1 %v3895_v24 }
0x111a   : > { %v3897_v25 = vpop.xlane.xlu1 %3896 }
0x111b   : > { %v3898_v26 = vmul.f32 0.03125, %v3897_v25 }
0x111d   : > { %v3899_v27 = vsub.f32 %v3890_v23, %v3898_v26  ;;  %v4122_v23 = vld [vmem:[%s6296_s1] sm:$0x1] }
0x111f   : > { %v3900_v29 = vmul.f32 %v3899_v27, %v3899_v27 }
0x1121   : > { %v3901_v17 = vsel %vm822_vm4, %v3900_v29, 0.0 }
0x1122   : > { %3902 = vadd.xlane.f32.xlu0 %v3901_v17 }
0x11af   : > { %v3903_v39 = vpop.xlane.xlu0 %3902 }
0x11b0   : > { %v3904_v31 = vmul.f32 0.03125, %v3903_v39 }
0x11b2   : > { %v3905_v33 = vadd.f32 1e-12, %v3904_v31 }
0x11b4   : > { %5213 = vrsqrt.f32 %v3905_v33 }
0x11be   : > { %v5214_v34 = vpop.eup %5213 }
0x11bf   : > { %v3907_v36 = vmul.f32 %v5214_v34, %v3899_v27 }
0x11c1   : > { %v3914_v38 = vmul.f32 %v4488_v35, %v3907_v36 }
0x11c3   : > { %v3921_v40 = vadd.f32 %v4489_v37, %v3914_v38 }
0x11c5   : > { %v3922_v41 = vpack.c.bf16 %v3921_v40, %v3921_v40 }
0x11c7   : > { %5041 = vmatmul.mubr.msk.bf16.vlgmr.msra.gmra.mrb[100].mxu1 %vm822_vm4, %v3922_v41 }
0x11c8   : > { %5060 = vmatprep.mubr.msk.bf16.mxu1 %vm5287_vm1, %v5286_v2  ;;  %5057 = vmatpush3.bf16.msra.mxu1 %v5171_v12 }
0x11c9   : > { %5058 = vmatprep.subr.bf16.mxu1 %v5286_v2 }
0x11cc   : > { %5059 = vmatpush3.bf16.msra.mxu1 %v5172_v13 }
0x129a   : > { %v3985_v45 = vpop.f32.mrb[100].mxu1 }
0x129b   : > { %v3986_v46 = vadd.f32 %v4495_v51, %v3985_v45  ;;  %v5042_v47 = vpop.f32.mrb[101].mxu1 }
0x129c   : > { %v3988_v48 = vpop.f32.mrb[102].mxu1 }
0x129d   : > { %v3991_v49 = vmul.f32 %v3986_v46, %v3986_v46  ;;  %v5043_v50 = vpop.f32.mrb[103].mxu1 }
0x129f   : > { %v3992_v52 = vmul.f32 %v3991_v49, %v3986_v46 }
0x12a1   : > { %v3993_v53 = vmul.f32 0.044715, %v3992_v52 }
0x12a3   : > { %v3994_v54 = vadd.f32 %v3993_v53, %v3986_v46 }
0x12a5   : > { %v3995_v55 = vmul.f32 0.7978846, %v3994_v54 }
0x12a7   : > { %5215 = vtanh.f32 %v3995_v55 }
0x12b1   : > { %v5216_v56 = vpop.eup %5215 }
0x12b2   : > { %v3997_v58 = vadd.f32 1.0, %v5216_v56 }
0x12b4   : > { %v3998_v59 = vmul.f32 0.5, %v3997_v58 }
0x12b6   : > { %v3999_v60 = vmul.f32 %v3998_v59, %v3986_v46 }
0x12b8   : > { %v4000_v61 = vpack.c.bf16 %v3999_v60, %v3999_v60 }
0x12ba   : > { %5053 = vmatmul.mubr.msk.bf16.vlgmr.msra.gmra.mrb[104].mxu0 %vm2409_vm7, %v4000_v61 }
0x138d   : > { %v4079_v62 = vpop.f32.mrb[104].mxu0 }
0x138e   : > { %v4080_v63 = vadd.f32 %v4508_v32, %v4079_v62  ;;  %v5054_v0 = vpop.f32.mrb[105].mxu0 }
0x138f   : > { %v4082_v1 = vpop.f32.mrb[106].mxu0 }
0x1390   : > { %v5055_v3 = vpop.f32.mrb[107].mxu0  ;;  %v4085_v4 = vadd.f32 %v4080_v63, %v3921_v40 }
0x1392   : > { %v4090_v5 = vsel %vm822_vm4, %v4085_v4, 0.0 }
0x1393   : > { %4091 = vadd.xlane.f32.xlu1 %v4090_v5 }
0x1420   : > { %v4092_v7 = vpop.xlane.xlu1 %4091 }
0x1421   : > { %v4093_v8 = vmul.f32 0.03125, %v4092_v7 }
0x1423   : > { %v4094_v9 = vsub.f32 %v4085_v4, %v4093_v8 }
0x1425   : > { %v4095_v10 = vmul.f32 %v4094_v9, %v4094_v9 }
0x1427   : > { %v4096_v11 = vsel %vm822_vm4, %v4095_v10, 0.0 }
0x1428   : > { %4097 = vadd.xlane.f32.xlu0 %v4096_v11 }
0x14b5   : > { %v4098_v14 = vpop.xlane.xlu0 %4097 }
0x14b6   : > { %v4099_v15 = vmul.f32 0.03125, %v4098_v14 }
0x14b8   : > { %v4100_v16 = vadd.f32 1e-12, %v4099_v15 }
0x14ba   : > { %5217 = vrsqrt.f32 %v4100_v16 }
0x14c4   : > { %v5218_v18 = vpop.eup %5217 }
0x14c5   : > { %v4102_v57 = vmul.f32 %v5218_v18, %v4094_v9 }
0x14c7   : > { %v4109_v21 = vmul.f32 %v4516_v19, %v4102_v57 }
0x14c9   : > { %v4116_v22 = vadd.f32 %v4517_v20, %v4109_v21 }
0x14cb   : > { %v4117_v2 = vpack.c.bf16 %v4116_v22, %v4116_v22 }
0x14cd   : > { %5061 = vmatmul.mubr.msk.bf16.vlgmr.msra.gmra.mrb[104].mxu1 %vm822_vm4, %v4117_v2 }
0x15a0   : > { %v4172_v24 = vpop.f32.mrb[104].mxu1 }
0x15a1   : > { %v4173_v25 = vadd.f32 %v4172_v24, %v4122_v23  ;;  %v5062_v26 = vpop.f32.mrb[105].mxu1 }
0x15a2   : > { %v4175_v27 = vpop.f32.mrb[106].mxu1 }
0x15a3   : > { %5219 = vtanh.f32 %v4173_v25  ;;  %v5063_v29 = vpop.f32.mrb[107].mxu1 }
0x15ad   : > { %v5220_v17 = vpop.eup %5219 }
0x15ae   : > { %4180 = vst.msk [vmem:[%s697_s29] sm:$0x1] %vm4179_vm8, %v5220_v17 }
0x15af   : > { %5234 = shalt.err (!%p5231_p3)
}
0x15b0   : > { %s5235_s1 = scalar_lea.hbm %s6193_s6, 16  ;;  %s5239_s29 = scalar_lea.hbm %s6298_s24, 32 }
0x15b1   : > { %p5236_p4 = scmp.ne.s32.totalorder %s6193_s6, %s5235_s1  ;;  %p5240_p9 = scmp.lt.u32.totalorder %s6193_s6, %s6298_s24 }
0x15b2   : > { %p5241_p10 = scmp.lt.u32.totalorder %s5239_s29, %s5235_s1  ;;  %p5243_p12 = scmp.lt.u32.totalorder %s5235_s1, %s6193_s6 }
0x15b3   : > { %p5237_p7 = pnand %p5236_p4, %p5442_p5 }
0x15b4   : > { %p5242_p11 = por %p5241_p10, %p5240_p9 }
0x15b5   : > { %p5238_p8 = pneg %p5237_p7 }
0x15b6   : > { %p5244_p13 = por %p5243_p12, %p5242_p11 }
0x15b8   : > { %p5245_p0 = pnand %p5244_p13, %p5238_p8 }
0x15ba   : > { %5248 = shalt.err (!%p5245_p0)
}
0x15bb   : > { %5064 = dma.vmem_to_hbm [thread:$0]  (%p5442_p5), %s6195_s30, 16, %s6193_s6, %s4182_s5  }
0x15bc PF: > { %s6299_s26 = sld [smem:[#allocation7_spill]]  ;;  %s6300_s25 = sld [smem:[#allocation5_spill]] }
0x15c2   : > { %p5070_p1 = scmp.ge.s32.totalorder %s6299_s26, 2  ;;  %s4206_s0 = sand.u32 1, %s6300_s25  }
0x15c3   : > { %s4207_s22 = scalar_lea.sflag [#allocation3], %s4206_s0 }
0x15c4   : > { %p5067_p2 = pnand %p5070_p1, %p5446_p6 }
0x15c6   : > { %5266 = dma.done.wait (!%p5067_p2), %s4207_s22, 16  }
0x15c7   : > { %5268 = vsyncadd (!%p5067_p2), %s4207_s22, 4294967280  ;;  %s6302_s30 = sld [smem:[#allocation9_spill]]  ;;  %s6303_s1 = sld [smem:[#allocation6_spill]] }
0x15c8   : > { %s6304_s29 = sld [smem:[#allocation10_spill]]  ;;  %s6305_s3 = smov %s5275_s28 }
0x15cd   : > { %p32_p3 = scmp.ge.s32.totalorder %s6302_s30, 4   ;;  %s6306_s28 = smov %s6303_s1 }
0x15cf   :  { %34 = sbr.rel (!%p32_p3) target bundleno = 13 (0xd), region = 161 }
0x15d6   :  { %4211 = vsyncpa [#allocation3], 1 }
0x15d7   :  { %4213 = vsyncpa [#allocation3 + $0x1], 1 }

</bundles_post_ra>
